<compile_context>
chip_gen: v6e
topology: v6e:2x2x1
jax: 0.10.0
libtpu: 0.0.40
codegen_flags: <defaults>
</compile_context>

<pallas_src>
import jax
import jax.numpy as jnp
from jax.experimental import pallas as pl
from jax.experimental.pallas import tpu as pltpu


_INV_SQRT2 = 0.7071067811865476


def _gelu_exact(x):
    # Matches torch.nn.functional.gelu default (erf-based, not tanh approx).
    return 0.5 * x * (1.0 + jax.scipy.special.erf(x * _INV_SQRT2))


def _round_up(x, m):
    return ((x + m - 1) // m) * m


def _grm_mlp_kernel(x_ref, w1_ref, w2_ref, wgb_ref, wgr_ref, wf_ref,
                    o_ref, x_carry):
    d = pl.program_id(1)
    cdtype = w1_ref.dtype  # matmul operand dtype (bf16 by default)

    # Initialize the carried residual from the input row tile at layer 0.
    @pl.when(d == 0)
    def _():
        x_carry[...] = x_ref[...].astype(jnp.float32)

    res = x_carry[...]                                  # f32 [tile_rows, dim_p]
    xc = res.astype(cdtype)

    hidden = jnp.dot(xc, w1_ref[...], preferred_element_type=jnp.float32)
    hidden = _gelu_exact(hidden)                        # f32 elementwise
    branch = jnp.dot(hidden.astype(cdtype), w2_ref[...],
                     preferred_element_type=jnp.float32)

    # gates = cat((branch, res), -1) @ to_gates, split into two matmuls.
    gates = (jnp.dot(branch.astype(cdtype), wgb_ref[...],
                     preferred_element_type=jnp.float32)
             + jnp.dot(xc, wgr_ref[...], preferred_element_type=jnp.float32))
    g = jax.nn.sigmoid(gates)                           # f32

    # torch lerp: res + g * (branch - res)
    new_x = res + g * (branch - res)
    x_carry[...] = new_x

    # Final projection only after the last layer.
    @pl.when(d == pl.num_programs(1) - 1)
    def _():
        o_ref[...] = jnp.dot(new_x.astype(cdtype), wf_ref[...],
                             preferred_element_type=jnp.float32
                             ).astype(o_ref.dtype)


def gated_residual_memory_mlp(x, w1, w2, wg_branch, wg_res, w_final, *,
                              tile_rows=256, compute_dtype=jnp.bfloat16,
                              lane_multiple=128):
    """x: [..., dim] float32.  Returns same shape, float32."""
    orig_shape = x.shape
    dim = orig_shape[-1]
    depth, _, dim_hidden = w1.shape

    x2d = x.reshape(-1, dim)
    n = x2d.shape[0]

    # Pad feature dims to lane-dense multiples of 128; rows to tile multiple.
    dim_p = _round_up(dim, lane_multiple)
    dh_p = _round_up(dim_hidden, lane_multiple)
    tile_rows = max(8, _round_up(tile_rows, 8))
    n_p = _round_up(max(n, tile_rows), tile_rows)

    x_p = jnp.pad(x2d, ((0, n_p - n), (0, dim_p - dim)))
    w1_p = jnp.pad(w1, ((0, 0), (0, dim_p - dim), (0, dh_p - dim_hidden))
                   ).astype(compute_dtype)
    w2_p = jnp.pad(w2, ((0, 0), (0, dh_p - dim_hidden), (0, dim_p - dim))
                   ).astype(compute_dtype)
    wgb_p = jnp.pad(wg_branch, ((0, 0), (0, dim_p - dim), (0, dim_p - dim))
                    ).astype(compute_dtype)
    wgr_p = jnp.pad(wg_res, ((0, 0), (0, dim_p - dim), (0, dim_p - dim))
                    ).astype(compute_dtype)
    wf_p = jnp.pad(w_final, ((0, dim_p - dim), (0, dim_p - dim))
                   ).astype(compute_dtype)

    grid = (n_p // tile_rows, depth)

    # Explicit VMEM budget: 2x each pipelined block + carry scratch + headroom.
    wbytes = jnp.dtype(compute_dtype).itemsize
    abytes = 4
    vmem_bytes = (
        2 * tile_rows * dim_p * abytes            # x input (double-buffered)
        + 2 * tile_rows * dim_p * abytes          # output
        + 2 * dim_p * dh_p * wbytes * 2           # w1 + w2 (per-layer blocks)
        + 2 * dim_p * dim_p * wbytes * 2          # wg_branch + wg_res
        + 2 * dim_p * dim_p * wbytes              # w_final
        + tile_rows * dim_p * abytes              # f32 residual carry scratch
        + 4 * tile_rows * max(dim_p, dh_p) * abytes  # in-flight f32 intermediates
    )
    vmem_limit = int(min(max(vmem_bytes + (8 << 20), 32 << 20), 64 << 20))

    out_p = pl.pallas_call(
        _grm_mlp_kernel,
        out_shape=jax.ShapeDtypeStruct((n_p, dim_p), jnp.float32),
        grid_spec=pltpu.PrefetchScalarGridSpec(
            num_scalar_prefetch=0,
            grid=grid,
            in_specs=[
                pl.BlockSpec((tile_rows, dim_p), lambda i, d: (i, 0)),
                pl.BlockSpec((None, dim_p, dh_p), lambda i, d: (d, 0, 0)),
                pl.BlockSpec((None, dh_p, dim_p), lambda i, d: (d, 0, 0)),
                pl.BlockSpec((None, dim_p, dim_p), lambda i, d: (d, 0, 0)),
                pl.BlockSpec((None, dim_p, dim_p), lambda i, d: (d, 0, 0)),
                pl.BlockSpec((dim_p, dim_p), lambda i, d: (0, 0)),
            ],
            out_specs=pl.BlockSpec((tile_rows, dim_p), lambda i, d: (i, 0)),
            scratch_shapes=[pltpu.VMEM((tile_rows, dim_p), jnp.float32)],
        ),
        compiler_params=pltpu.CompilerParams(
            dimension_semantics=("parallel", "arbitrary"),
            vmem_limit_bytes=vmem_limit,
        ),
    )(x_p, w1_p, w2_p, wgb_p, wgr_p, wf_p)

    return out_p[:n, :dim].reshape(orig_shape)


def _xavier_uniform(key, shape, dtype=jnp.float32):
    fan_in, fan_out = shape[-2], shape[-1]
    bound = jnp.sqrt(6.0 / (fan_in + fan_out))
    return jax.random.uniform(key, shape, dtype, minval=-bound, maxval=bound)


def _reference(x2d, w1, w2, wg_branch, wg_res, w_final):
    # Pure-JAX, f32 reference of the PyTorch forward.
    x = x2d.astype(jnp.float32)
    depth = w1.shape[0]
    for d in range(depth):
        res = x
        hidden = _gelu_exact(x @ w1[d])
        branch = hidden @ w2[d]
        gates = branch @ wg_branch[d] + res @ wg_res[d]
        g = jax.nn.sigmoid(gates)
        x = res + g * (branch - res)
    return x @ w_final


if __name__ == "__main__":
    # Small, module-consistent shapes.
    batch, seq, dim = 2, 8, 32
    depth = 2
    expansion_factor = 4.0
    dim_hidden = int(dim * expansion_factor)

    key = jax.random.PRNGKey(0)
    kx, k1, k2, kg, kf = jax.random.split(key, 5)

    # Deterministic parameter init (xavier_uniform, as in the module __init__).
    k1s = jax.random.split(k1, depth)
    k2s = jax.random.split(k2, depth)
    kgs = jax.random.split(kg, depth)
    w1 = jnp.stack([_xavier_uniform(k1s[d], (dim, dim_hidden)) for d in range(depth)])
    w2 = jnp.stack([_xavier_uniform(k2s[d], (dim_hidden, dim)) for d in range(depth)])
    to_gates = jnp.stack([_xavier_uniform(kgs[d], (dim * 2, dim)) for d in range(depth)])
    wg_branch = to_gates[:, :dim, :]   # applied to branch_out (first half of cat)
    wg_res = to_gates[:, dim:, :]      # applied to residual (second half of cat)
    w_final = _xavier_uniform(kf, (dim, dim))

    x = jax.random.normal(kx, (batch, seq, dim), dtype=jnp.float32)

    out = gated_residual_memory_mlp(x, w1, w2, wg_branch, wg_res, w_final,
                                    tile_rows=256)
    jax.block_until_ready(out)
    assert out.shape == (batch, seq, dim)

    # Correctness vs the f32 reference (bf16 MXU operands / f32 accumulation
    # inside the kernel -> loosened tolerance).
    ref = _reference(x.reshape(-1, dim), w1, w2, wg_branch, wg_res,
                     w_final).reshape(batch, seq, dim)
    max_err = float(jnp.max(jnp.abs(out - ref)))
    assert jnp.allclose(out, ref, atol=7.5e-2, rtol=7.5e-2), \
        f"mismatch vs reference (max abs err {max_err})"

    print("KERNEL_OK")
</pallas_src>

<mosaic_0001>
module attributes {stable_mosaic.version = 11 : i64} {
  func.func @_grm_mlp_kernel(%arg0: i32, %arg1: i32, %arg2: memref<256x128xf32, #tpu.memory_space<vmem>>, %arg3: memref<1x128x128xbf16, #tpu.memory_space<vmem>>, %arg4: memref<1x128x128xbf16, #tpu.memory_space<vmem>>, %arg5: memref<1x128x128xbf16, #tpu.memory_space<vmem>>, %arg6: memref<1x128x128xbf16, #tpu.memory_space<vmem>>, %arg7: memref<128x128xbf16, #tpu.memory_space<vmem>>, %arg8: memref<256x128xf32, #tpu.memory_space<vmem>>, %arg9: memref<256x128xf32, #tpu.memory_space<vmem>>) attributes {dimension_semantics = [#tpu.dimension_semantics<parallel>, #tpu.dimension_semantics<arbitrary>], iteration_bounds = array<i64: 1, 2>, scalar_prefetch = 0 : i64, scratch_operands = 1 : i64, tpu.core_type = #tpu.core_type<tc>, window_params = [{transform_indices = @transform_0, window_bounds = array<i64: 256, 128>}, {transform_indices = @transform_1, window_bounds = array<i64: 1, 128, 128>}, {transform_indices = @transform_2, window_bounds = array<i64: 1, 128, 128>}, {transform_indices = @transform_3, window_bounds = array<i64: 1, 128, 128>}, {transform_indices = @transform_4, window_bounds = array<i64: 1, 128, 128>}, {pipeline_mode = #tpu.pipeline_mode<synchronous>, transform_indices = @transform_5, window_bounds = array<i64: 128, 128>}, {transform_indices = @transform_6, window_bounds = array<i64: 256, 128>}]} {
    %c0_i32 = arith.constant 0 : i32
    %0 = arith.cmpi eq, %arg1, %c0_i32 : i32
    %1 = arith.extui %0 : i1 to i32
    %c0_i32_0 = arith.constant 0 : i32
    %2 = arith.cmpi ne, %1, %c0_i32_0 : i32
    scf.if %2 {
      %c0_24 = arith.constant 0 : index
      %c0_25 = arith.constant 0 : index
      %40 = vector.load %arg2[%c0_24, %c0_25] : memref<256x128xf32, #tpu.memory_space<vmem>>, vector<256x128xf32>
      %c0_26 = arith.constant 0 : index
      %c0_27 = arith.constant 0 : index
      %41 = vector.load %arg9[%c0_26, %c0_27] : memref<256x128xf32, #tpu.memory_space<vmem>>, vector<256x128xf32>
      tpu.vector_store %arg9[%c0_26, %c0_27], %40 {strides = array<i32>} : memref<256x128xf32, #tpu.memory_space<vmem>>, vector<256x128xf32>,
    } else {
    }
    %c0 = arith.constant 0 : index
    %c0_1 = arith.constant 0 : index
    %3 = vector.load %arg9[%c0, %c0_1] : memref<256x128xf32, #tpu.memory_space<vmem>>, vector<256x128xf32>
    %4 = arith.truncf %3 : vector<256x128xf32> to vector<256x128xbf16>
    %c0_2 = arith.constant 0 : index
    %c0_3 = arith.constant 0 : index
    %c0_4 = arith.constant 0 : index
    %5 = vector.load %arg3[%c0_2, %c0_3, %c0_4] : memref<1x128x128xbf16, #tpu.memory_space<vmem>>, vector<1x128x128xbf16>
    %6 = vector.shape_cast %5 : vector<1x128x128xbf16> to vector<128x128xbf16>
    %cst = arith.constant dense<0.000000e+00> : vector<256x128xf32>
    %7 = tpu.matmul %4, %6, %cst {dimension_numbers = #tpu.dot_dimension_numbers<[1], [0], [0], [1], [0, 0, 1, 1], [], []>} : vector<256x128xbf16>, vector<128x128xbf16>, vector<256x128xf32> -> vector<256x128xf32>
    %cst_5 = arith.constant 5.000000e-01 : f32
    %8 = vector.broadcast %cst_5 : f32 to vector<256x128xf32>
    %9 = arith.mulf %8, %7 : vector<256x128xf32>
    %cst_6 = arith.constant 0.707106769 : f32
    %10 = vector.broadcast %cst_6 : f32 to vector<256x128xf32>
    %11 = arith.mulf %7, %10 : vector<256x128xf32>
    %12 = math.erf %11 : vector<256x128xf32>
    %cst_7 = arith.constant 1.000000e+00 : f32
    %13 = vector.broadcast %cst_7 : f32 to vector<256x128xf32>
    %14 = arith.addf %13, %12 : vector<256x128xf32>
    %15 = arith.mulf %9, %14 : vector<256x128xf32>
    %16 = arith.truncf %15 : vector<256x128xf32> to vector<256x128xbf16>
    %c0_8 = arith.constant 0 : index
    %c0_9 = arith.constant 0 : index
    %c0_10 = arith.constant 0 : index
    %17 = vector.load %arg4[%c0_8, %c0_9, %c0_10] : memref<1x128x128xbf16, #tpu.memory_space<vmem>>, vector<1x128x128xbf16>
    %18 = vector.shape_cast %17 : vector<1x128x128xbf16> to vector<128x128xbf16>
    %cst_11 = arith.constant dense<0.000000e+00> : vector<256x128xf32>
    %19 = tpu.matmul %16, %18, %cst_11 {dimension_numbers = #tpu.dot_dimension_numbers<[1], [0], [0], [1], [0, 0, 1, 1], [], []>} : vector<256x128xbf16>, vector<128x128xbf16>, vector<256x128xf32> -> vector<256x128xf32>
    %20 = arith.truncf %19 : vector<256x128xf32> to vector<256x128xbf16>
    %c0_12 = arith.constant 0 : index
    %c0_13 = arith.constant 0 : index
    %c0_14 = arith.constant 0 : index
    %21 = vector.load %arg5[%c0_12, %c0_13, %c0_14] : memref<1x128x128xbf16, #tpu.memory_space<vmem>>, vector<1x128x128xbf16>
    %22 = vector.shape_cast %21 : vector<1x128x128xbf16> to vector<128x128xbf16>
    %cst_15 = arith.constant dense<0.000000e+00> : vector<256x128xf32>
    %23 = tpu.matmul %20, %22, %cst_15 {dimension_numbers = #tpu.dot_dimension_numbers<[1], [0], [0], [1], [0, 0, 1, 1], [], []>} : vector<256x128xbf16>, vector<128x128xbf16>, vector<256x128xf32> -> vector<256x128xf32>
    %c0_16 = arith.constant 0 : index
    %c0_17 = arith.constant 0 : index
    %c0_18 = arith.constant 0 : index
    %24 = vector.load %arg6[%c0_16, %c0_17, %c0_18] : memref<1x128x128xbf16, #tpu.memory_space<vmem>>, vector<1x128x128xbf16>
    %25 = vector.shape_cast %24 : vector<1x128x128xbf16> to vector<128x128xbf16>
    %cst_19 = arith.constant dense<0.000000e+00> : vector<256x128xf32>
    %26 = tpu.matmul %4, %25, %cst_19 {dimension_numbers = #tpu.dot_dimension_numbers<[1], [0], [0], [1], [0, 0, 1, 1], [], []>} : vector<256x128xbf16>, vector<128x128xbf16>, vector<256x128xf32> -> vector<256x128xf32>
    %27 = arith.addf %23, %26 : vector<256x128xf32>
    %28 = arith.negf %27 : vector<256x128xf32>
    %29 = math.exp %28 : vector<256x128xf32>
    %cst_20 = arith.constant 1.000000e+00 : f32
    %30 = vector.broadcast %cst_20 : f32 to vector<256x128xf32>
    %31 = arith.addf %30, %29 : vector<256x128xf32>
    %32 = arith.divf %30, %31 : vector<256x128xf32>
    %33 = arith.subf %19, %3 : vector<256x128xf32>
    %34 = arith.mulf %32, %33 : vector<256x128xf32>
    %35 = arith.addf %3, %34 : vector<256x128xf32>
    %c0_21 = arith.constant 0 : index
    %c0_22 = arith.constant 0 : index
    %36 = vector.load %arg9[%c0_21, %c0_22] : memref<256x128xf32, #tpu.memory_space<vmem>>, vector<256x128xf32>
    tpu.vector_store %arg9[%c0_21, %c0_22], %35 {strides = array<i32>} : memref<256x128xf32, #tpu.memory_space<vmem>>, vector<256x128xf32>,
    %c1_i32 = arith.constant 1 : i32
    %37 = arith.cmpi eq, %arg1, %c1_i32 : i32
    %38 = arith.extui %37 : i1 to i32
    %c0_i32_23 = arith.constant 0 : i32
    %39 = arith.cmpi ne, %38, %c0_i32_23 : i32
    scf.if %39 {
      %40 = arith.truncf %35 : vector<256x128xf32> to vector<256x128xbf16>
      %c0_24 = arith.constant 0 : index
      %c0_25 = arith.constant 0 : index
      %41 = vector.load %arg7[%c0_24, %c0_25] : memref<128x128xbf16, #tpu.memory_space<vmem>>, vector<128x128xbf16>
      %cst_26 = arith.constant dense<0.000000e+00> : vector<256x128xf32>
      %42 = tpu.matmul %40, %41, %cst_26 {dimension_numbers = #tpu.dot_dimension_numbers<[1], [0], [0], [1], [0, 0, 1, 1], [], []>} : vector<256x128xbf16>, vector<128x128xbf16>, vector<256x128xf32> -> vector<256x128xf32>
      %c0_27 = arith.constant 0 : index
      %c0_28 = arith.constant 0 : index
      %43 = vector.load %arg8[%c0_27, %c0_28] : memref<256x128xf32, #tpu.memory_space<vmem>>, vector<256x128xf32>
      tpu.vector_store %arg8[%c0_27, %c0_28], %42 {strides = array<i32>} : memref<256x128xf32, #tpu.memory_space<vmem>>, vector<256x128xf32>,
    } else {
    }
    return
  }
  func.func @transform_0(%arg0: i32, %arg1: i32) -> (i32, i32) {
    %c0_i32 = arith.constant 0 : i32
    %c0_i32_0 = arith.constant 0 : i32
    return %arg0, %c0_i32 : i32, i32
  }
  func.func @transform_1(%arg0: i32, %arg1: i32) -> (i32, i32, i32) {
    %c0_i32 = arith.constant 0 : i32
    %c0_i32_0 = arith.constant 0 : i32
    %c0_i32_1 = arith.constant 0 : i32
    return %arg1, %c0_i32, %c0_i32_0 : i32, i32, i32
  }
  func.func @transform_2(%arg0: i32, %arg1: i32) -> (i32, i32, i32) {
    %c0_i32 = arith.constant 0 : i32
    %c0_i32_0 = arith.constant 0 : i32
    %c0_i32_1 = arith.constant 0 : i32
    return %arg1, %c0_i32, %c0_i32_0 : i32, i32, i32
  }
  func.func @transform_3(%arg0: i32, %arg1: i32) -> (i32, i32, i32) {
    %c0_i32 = arith.constant 0 : i32
    %c0_i32_0 = arith.constant 0 : i32
    %c0_i32_1 = arith.constant 0 : i32
    return %arg1, %c0_i32, %c0_i32_0 : i32, i32, i32
  }
  func.func @transform_4(%arg0: i32, %arg1: i32) -> (i32, i32, i32) {
    %c0_i32 = arith.constant 0 : i32
    %c0_i32_0 = arith.constant 0 : i32
    %c0_i32_1 = arith.constant 0 : i32
    return %arg1, %c0_i32, %c0_i32_0 : i32, i32, i32
  }
  func.func @transform_5(%arg0: i32, %arg1: i32) -> (i32, i32) {
    %c0_i32 = arith.constant 0 : i32
    %c0_i32_0 = arith.constant 0 : i32
    %c0_i32_1 = arith.constant 0 : i32
    return %c0_i32, %c0_i32_0 : i32, i32
  }
  func.func @transform_6(%arg0: i32, %arg1: i32) -> (i32, i32) {
    %c0_i32 = arith.constant 0 : i32
    %c0_i32_0 = arith.constant 0 : i32
    return %arg0, %c0_i32 : i32, i32
  }
}

</mosaic_0001>

<bundles_post_ra>
// kernel: tpu_custom_call.1
= control target key start
LH: loop header
LB: loop body
LE: loop exit
PB: predicated region body
PF: predicated region fallthrough
CT: control target
= control target key end

     0   :  { %s4284_s0 = inlined_call_operand.hbm [shape: f32[256,128], index: 0, kind: input, shape index: {}]   ;;  %s4285_s1 = inlined_call_operand.hbm [shape: bf16[2,128,128], index: 1, kind: input, shape index: {}]   ;;  %s4286_s2 = inlined_call_operand.hbm [shape: bf16[2,128,128], index: 2, kind: input, shape index: {}]   ;;  %s4287_s3 = inlined_call_operand.hbm [shape: bf16[2,128,128], index: 3, kind: input, shape index: {}]   ;;  %s4288_s4 = inlined_call_operand.hbm [shape: bf16[2,128,128], index: 4, kind: input, shape index: {}]   ;;  %s4289_s5 = inlined_call_operand.hbm [shape: bf16[128,128], index: 5, kind: input, shape index: {}]   ;;  %s4290_s6 = inlined_call_operand.hbm [shape: f32[256,128], index: 6, kind: output, shape index: {}]  }
   0x1   :  { %4295 = sst [smem:[#allocation20_spill]] %s4284_s0 }
   0x2   :  { %4296 = sst [smem:[#allocation21_spill]] %s4285_s1 }
   0x3   :  { %4297 = sst [smem:[#allocation22_spill]] %s4286_s2 }
   0x4   :  { %4298 = sst [smem:[#allocation23_spill]] %s4287_s3 }
   0x5   :  { %11 = vsyncpa [#allocation4], 0 }
   0x6   :  { %12 = vsyncpa [#allocation7], 0 }
   0x7   :  { %14 = vsyncpa [#allocation7 + $0x1], 0 }
   0x8   :  { %15 = vsyncpa [#allocation10], 0 }
   0x9   :  { %17 = vsyncpa [#allocation10 + $0x1], 0 }
   0xa   :  { %18 = vsyncpa [#allocation13], 0 }
   0xb   :  { %19 = vsyncpa [#allocation5], 0  ;;  %s3549_s21 = smov 0   ;;  %s3551_s22 = smov 0  }
   0xc   :  { %s3553_s23 = smov 0   ;;  %s3555_s24 = smov 0  }
   0xd   :  { %s3557_s25 = smov 0   ;;  %s3559_s26 = smov 0  }
   0xe LB: > { %s34_s27 = sadd.s32 1, %s3495_s25  ;;  %s70_s28 = sadd.s32 1, %s3487_s23  ;;  %s3499_s26 = sphi %s3559_s26, %s25_s26   ;;  %s3495_s25 = sphi %s3557_s25, %s4316_s25   ;;  %s3491_s24 = sphi %s3555_s24, %s4315_s24   ;;  %s3487_s23 = sphi %s3553_s23, %s4314_s23   ;;  %s3483_s22 = sphi %s3551_s22, %s4313_s22   ;;  %s3479_s21 = sphi %s3549_s21, %s4312_s21  }
   0xf   : > { %p35_p0 = scmp.ge.s32.totalorder %s34_s27, 2  ;;  %p77_p1 = scmp.ne.s32.totalorder %s3487_s23, %s3483_s22 }
  0x10   : > { %p78_p2 = scmp.eq.s32.totalorder %s3499_s26, 0  ;;  %p2919_p5 = scmp.lt.s32.totalorder %s3499_s26, 2 }
  0x11   : > { %s4318_s27 = smov (%p35_p0, %s34_s27), 0  ;;  %s261_s7 = sand.u32 1, %s3499_s26  }
  0x12   : > { %p3586_p3 = por %p78_p2, %p77_p1  ;;  %s67_s30 = ssub.s32 %s3495_s25, %s4318_s27 }
  0x13   : > { %p68_p4 = scmp.eq.s32.totalorder %s67_s30, 0  ;;  %s263_s8 = sand.u32 1, %s3487_s23  }
  0x14   : > { %s3598_s10 = sshll.u32 %s263_s8, 6  ;;  %s3601_s11 = sshll.u32 %s3495_s25, 10 }
  0x15   : > { %s3596_s9 = scalar_select %p68_p4, %s3487_s23, %s70_s28  }
  0x16   : > { %s4300_s1 = sld [smem:[#allocation21_spill]]  ;;  %s265_s15 = scalar_lea.vmem [#allocation6], %s3598_s10 }
  0x17   : > { %s272_s16 = sshll.u32 %s265_s15, 4  ;;  %p3610_p6 = pnand %p2919_p5, %p3586_p3  ;;  %s273_s16 = int_to_ptr.vmem [resolvable:$true] %s272_s16 }
  0x18   : > { %s4302_s3 = sld [smem:[#allocation23_spill]]  ;;  %s3620_s28 = scalar_lea.sflag [#allocation7], %s261_s7 }
  0x19   : > { %p3247_p7 = pneg %p3610_p6  ;;  %s3258_s30 = scalar_lea.vmem %s273_s16, 1024 }
  0x1a   : > { %p3259_p8 = scmp.ne.s32.totalorder %s273_s16, %s3258_s30  ;;  %s3501_s29 = smov [#allocation6]  }
  0x1b   : > { %s3263_s8 = sshll.u32 %s3501_s29, 4  ;;  %s3264_s8 = int_to_ptr.vmem [resolvable:$false] %s3263_s8 }
  0x1c   : > { %s271_s14 = scalar_lea.hbm %s4300_s1, %s3601_s11  ;;  %p3261_p9 = pnand %p3259_p8, %p3247_p7 }
  0x1d   : > { %s3265_s12 = scalar_lea.vmem %s3264_s8, 2048  ;;  %p3266_p11 = scmp.lt.s32.totalorder %s273_s16, %s3264_s8 }
  0x1e   : > { %p3262_p10 = pneg %p3261_p9  ;;  %p3267_p12 = scmp.lt.s32.totalorder %s3265_s12, %s3258_s30 }
  0x20   : > { %p3268_p13 = por %p3267_p12, %p3266_p11 }
  0x22   : > { %p3269_p0 = pnand %p3268_p13, %p3262_p10 }
  0x24   : > { %3272 = shalt.err (!%p3269_p0)
}
  0x25   : > { %s4291_s13 = smov 64   ;;  %s4293_s15 = smov 4  }
  0x26   : > { %2907 = dma.hbm_to_vmem [thread:$0]  (!%p3610_p6), %s271_s14, 1024, %s273_s16, %s3620_s28, %s4291_s13, %s4291_s13, %s4293_s15  }
  0x27   : > { %s307_s18 = scalar_lea.vmem [#allocation9], %s3598_s10  ;;  %s3636_s30 = scalar_lea.sflag [#allocation10], %s261_s7 }
  0x28   : > { %s314_s19 = sshll.u32 %s307_s18, 4  ;;  %s3504_s8 = smov [#allocation9]   ;;  %s315_s19 = int_to_ptr.vmem [resolvable:$true] %s314_s19 }
  0x29   : > { %s3286_s29 = scalar_lea.vmem %s315_s19, 1024  ;;  %s3291_s12 = sshll.u32 %s3504_s8, 4  ;;  %s3292_s12 = int_to_ptr.vmem [resolvable:$false] %s3291_s12 }
  0x2a   : > { %p3287_p1 = scmp.ne.s32.totalorder %s315_s19, %s3286_s29  ;;  %s3293_s20 = scalar_lea.vmem %s3292_s12, 2048 }
  0x2b   : > { %p3294_p4 = scmp.lt.s32.totalorder %s315_s19, %s3292_s12  ;;  %p3295_p5 = scmp.lt.s32.totalorder %s3293_s20, %s3286_s29 }
  0x2c   : > { %p3289_p2 = pnand %p3287_p1, %p3247_p7 }
  0x2d   : > { %p3296_p8 = por %p3295_p5, %p3294_p4 }
  0x2e   : > { %p3290_p3 = pneg %p3289_p2 }
  0x30   : > { %p3297_p9 = pnand %p3296_p8, %p3290_p3 }
  0x32   : > { %3300 = shalt.err (!%p3297_p9)
}
  0x33   : > { %s4303_s16 = scalar_lea.hbm %s4302_s3, %s3601_s11  ;;  %s3653_s20 = sadd.s32 4294967295, %s3499_s26  }
  0x34   : > { %2913 = dma.hbm_to_vmem [thread:$0]  (!%p3610_p6), %s4303_s16, 1024, %s315_s19, %s3636_s30, %s4291_s13, %s4291_s13, %s4293_s15  }
  0x35   : > { %p83_p10 = scmp.ne.s32.totalorder %s3483_s22, %s3479_s21  ;;  %p84_p11 = scmp.eq.s32.totalorder %s3653_s20, 0 }
  0x36   : > { %p2396_p12 = scmp.ge.s32.totalorder %s3499_s26, 1  ;;  %p219_p13 = scmp.lt.s32.totalorder %s3499_s26, 3 }
  0x37   : > { %p3662_p0 = por %p84_p11, %p83_p10  ;;  %s3505_s19 = smov [#allocation3]  }
  0x38   : > { %p3666_p1 = pnand %p2396_p12, %p219_p13  ;;  %s234_s8 = sshll.u32 %s3505_s19, 4  ;;  %s235_s8 = int_to_ptr.vmem [resolvable:$true] %s234_s8 }
  0x39   : > { %s3506_s12 = smov [#allocation12]   ;;  %s4307_s2 = sld [smem:[#allocation22_spill]] }
  0x3a   : > { %p2897_p2 = pneg %p3666_p1  ;;  %s247_s7 = sshll.u32 %s3506_s12, 4  ;;  %s3678_s7 = int_to_ptr.vmem [resolvable:$true] %s247_s7 }
  0x3b   : > { %s286_s15 = scalar_lea.vmem [#allocation8], %s3598_s10  ;;  %s3312_s1 = scalar_lea.vmem %s235_s8, 4096 }
  0x3c   : > { %p3674_p3 = pnand %p2897_p2, %p84_p11  ;;  %s293_s19 = sshll.u32 %s286_s15, 4  ;;  %s294_s19 = int_to_ptr.vmem [resolvable:$true] %s293_s19 }
  0x3d   : > { %p3313_p5 = scmp.ne.s32.totalorder %s235_s8, %s3312_s1  ;;  %p3320_p10 = scmp.lt.s32.totalorder %s235_s8, %s235_s8 }
  0x3e   : > { %p3303_p4 = pneg %p3674_p3  ;;  %p3321_p12 = scmp.lt.s32.totalorder %s3312_s1, %s3312_s1 }
  0x40   : > { %p3315_p8 = pnand %p3313_p5, %p3303_p4  ;;  %p3322_p13 = por %p3321_p12, %p3320_p10 }
  0x42   : > { %p3316_p9 = pneg %p3315_p8 }
  0x44   : > { %p3323_p2 = pnand %p3322_p13, %p3316_p9 }
  0x46   : > { %3326 = shalt.err (!%p3323_p2)
}
  0x47   : > { %s3507_s12 = smov 128   ;;  %s3508_s15 = smov 8  }
  0x48   : > { %s4308_s0 = sld [smem:[#allocation20_spill]]  ;;  %s3338_s13 = scalar_lea.vmem %s3678_s7, 1024 }
  0x49   : > { %p3339_p5 = scmp.ne.s32.totalorder %s3678_s7, %s3338_s13  ;;  %p3346_p9 = scmp.lt.s32.totalorder %s3678_s7, %s3678_s7 }
  0x4a   : > { %p3347_p12 = scmp.lt.s32.totalorder %s3338_s13, %s3338_s13 }
  0x4b   : > { %p3341_p8 = pnand %p3339_p5, %p3303_p4 }
  0x4c   : > { %p3348_p13 = por %p3347_p12, %p3346_p9 }
  0x4d   : > { %p3342_p10 = pneg %p3341_p8 }
  0x4e   : > { %2900 = dma.hbm_to_vmem [thread:$0]  (!%p3674_p3), %s4308_s0, 4096, %s235_s8, [#allocation4], %s3507_s12, %s3507_s12, %s3508_s15  }
  0x4f   : > { %p3349_p2 = pnand %p3348_p13, %p3342_p10 }
  0x51   : > { %3352 = shalt.err (!%p3349_p2)
}
  0x52   : > { %s4309_s1 = smov 4   ;;  %s4310_s3 = smov 64  }
  0x53   : > { %2903 = dma.hbm_to_vmem [thread:$0]  (!%p3674_p3), %s4289_s5, 1024, %s3678_s7, [#allocation13], %s4310_s3, %s4310_s3, %s4309_s1  }
  0x54   : > { %s3366_s12 = scalar_lea.vmem %s294_s19, 1024  ;;  %s3509_s13 = smov [#allocation8]  }
  0x55   : > { %p3367_p4 = scmp.ne.s32.totalorder %s294_s19, %s3366_s12  ;;  %s3371_s15 = sshll.u32 %s3509_s13, 4  ;;  %s3372_s15 = int_to_ptr.vmem [resolvable:$false] %s3371_s15 }
  0x56   : > { %s3373_s21 = scalar_lea.vmem %s3372_s15, 2048  ;;  %p3374_p10 = scmp.lt.s32.totalorder %s294_s19, %s3372_s15 }
  0x57   : > { %p3369_p5 = pnand %p3367_p4, %p3247_p7  ;;  %p3375_p9 = scmp.lt.s32.totalorder %s3373_s21, %s3366_s12 }
  0x59   : > { %p3370_p8 = pneg %p3369_p5  ;;  %p3376_p12 = por %p3375_p9, %p3374_p10 }
  0x5b   : > { %p3377_p13 = pnand %p3376_p12, %p3370_p8 }
  0x5d   : > { %3380 = shalt.err (!%p3377_p13)
}
  0x5e   : > { %s4311_s14 = scalar_lea.hbm %s4307_s2, %s3601_s11  ;;  %s334_s13 = scalar_lea.hbm %s4288_s4, %s3601_s11 }
  0x5f   : > { %2910 = dma.hbm_to_vmem [thread:$0]  (!%p3610_p6), %s4311_s14, 1024, %s294_s19, %s3620_s28, %s4310_s3, %s4310_s3, %s4309_s1  }
  0x60   : > { %s328_s15 = scalar_lea.vmem [#allocation11], %s3598_s10  ;;  %s3510_s7 = smov [#allocation11]  }
  0x61   : > { %s335_s21 = sshll.u32 %s328_s15, 4  ;;  %s3399_s16 = sshll.u32 %s3510_s7, 4  ;;  %s336_s21 = int_to_ptr.vmem [resolvable:$true] %s335_s21  ;;  %s3400_s16 = int_to_ptr.vmem [resolvable:$false] %s3399_s16 }
  0x62   : > { %s3394_s0 = scalar_lea.vmem %s336_s21, 1024  ;;  %s3401_s2 = scalar_lea.vmem %s3400_s16, 2048 }
  0x63   : > { %p3395_p3 = scmp.ne.s32.totalorder %s336_s21, %s3394_s0  ;;  %p3402_p5 = scmp.lt.s32.totalorder %s336_s21, %s3400_s16 }
  0x64   : > { %p3403_p8 = scmp.lt.s32.totalorder %s3401_s2, %s3394_s0 }
  0x65   : > { %p3397_p2 = pnand %p3395_p3, %p3247_p7 }
  0x66   : > { %p3404_p10 = por %p3403_p8, %p3402_p5 }
  0x67   : > { %p3398_p4 = pneg %p3397_p2 }
  0x69   : > { %p3405_p9 = pnand %p3404_p10, %p3398_p4 }
  0x6b   : > { %3408 = shalt.err (!%p3405_p9)
}
  0x6c   : > { %2916 = dma.hbm_to_vmem [thread:$0]  (!%p3610_p6), %s334_s13, 1024, %s336_s21, %s3636_s30, %s4310_s3, %s4310_s3, %s4309_s1  }
  0x6d   : > { %347 = sbr.rel (%p3666_p1) target bundleno = 1173 (0x495), region = 44 }
  0x72   : > { %3458 = dma.done.wait (%p84_p11), [#allocation4], 4096  }
  0x73   : > { %3460 = vsyncadd (%p84_p11), [#allocation4], 4294963200  ;;  %s353_s0 = sand.u32 1, %s3653_s20   ;;  %s355_s2 = sand.u32 1, %s3483_s22  }
  0x74   : > { %s2414_s10 = sshll.u32 %s355_s2, 6  ;;  %s354_s11 = scalar_lea.sflag [#allocation7], %s353_s0 }
  0x75   : > { %s3747_s17 = scalar_lea.vmem [#allocation6], %s2414_s10 }
  0x76   : > { %3462 = dma.done.wait (%p3662_p0), %s354_s11, 2048  }
  0x77   : > { %3464 = vsyncadd (%p3662_p0), %s354_s11, 4294965248  ;;  %s3753_s3 = scalar_lea.vmem [#allocation8], %s2414_s10  ;;  %s372_s28 = scalar_lea.sflag [#allocation10], %s353_s0 }
  0x78   : > { %s3755_s30 = scalar_lea.vmem [#allocation9], %s2414_s10 }
  0x79   : > { %3466 = dma.done.wait (%p3662_p0), %s372_s28, 2048  }
  0x7a   : > { %3468 = vsyncadd (%p3662_p0), %s372_s28, 4294965248  ;;  %s3761_s29 = scalar_lea.vmem [#allocation11], %s2414_s10 }
  0x7b   : > { %3470 = dma.done.wait (%p84_p11), [#allocation13], 1024  }
  0x7c   : > { %3472 = vsyncadd (%p84_p11), [#allocation13], 4294966272  ;;  %p2419_p6 = scmp.ne.s32.totalorder %s3491_s24, 0 }
  0x7e   : > { %433 = sbr.rel (%p2419_p6) target bundleno = 148 (0x94), region = 72 }
  0x83   : > { %v434_v0 = vld [vmem:[#allocation3] sm:$0xff]  ;;  %v435_v1 = vld [vmem:[#allocation3 + $0x8] sm:$0xff]  ;;  %v436_v2 = vld [vmem:[#allocation3 + $0x10] sm:$0xff] }
  0x84   : > { %466 = vst [vmem:[#allocation2 + $0xb0] sm:$0xff] %v434_v0  ;;  %467 = vst [vmem:[#allocation2] sm:$0xff] %v435_v1  ;;  %v437_v3 = vld [vmem:[#allocation3 + $0x18] sm:$0xff]  ;;  %v438_v4 = vld [vmem:[#allocation3 + $0x20] sm:$0xff] }
  0x85   : > { %468 = vst [vmem:[#allocation2 + $0xd8] sm:$0xff] %v436_v2  ;;  %v439_v5 = vld [vmem:[#allocation3 + $0x28] sm:$0xff]  ;;  %469 = vst [vmem:[#allocation2 + $0x18] sm:$0xff] %v437_v3  ;;  %v440_v6 = vld [vmem:[#allocation3 + $0x30] sm:$0xff] }
  0x86   : > { %470 = vst [vmem:[#allocation2 + $0x50] sm:$0xff] %v438_v4  ;;  %471 = vst [vmem:[#allocation2 + $0x68] sm:$0xff] %v439_v5  ;;  %v441_v7 = vld [vmem:[#allocation3 + $0x38] sm:$0xff]  ;;  %v442_v8 = vld [vmem:[#allocation3 + $0x40] sm:$0xff] }
  0x87   : > { %472 = vst [vmem:[#allocation2 + $0x30] sm:$0xff] %v440_v6  ;;  %473 = vst [vmem:[#allocation2 + $0x48] sm:$0xff] %v441_v7  ;;  %v443_v9 = vld [vmem:[#allocation3 + $0x48] sm:$0xff]  ;;  %v444_v10 = vld [vmem:[#allocation3 + $0x50] sm:$0xff] }
  0x88   : > { %474 = vst [vmem:[#allocation2 + $0x80] sm:$0xff] %v442_v8  ;;  %v445_v11 = vld [vmem:[#allocation3 + $0x58] sm:$0xff]  ;;  %475 = vst [vmem:[#allocation2 + $0x88] sm:$0xff] %v443_v9  ;;  %v446_v12 = vld [vmem:[#allocation3 + $0x60] sm:$0xff] }
  0x89   : > { %476 = vst [vmem:[#allocation2 + $0xe8] sm:$0xff] %v444_v10  ;;  %477 = vst [vmem:[#allocation2 + $0xb8] sm:$0xff] %v445_v11  ;;  %v447_v13 = vld [vmem:[#allocation3 + $0x68] sm:$0xff]  ;;  %v448_v14 = vld [vmem:[#allocation3 + $0x70] sm:$0xff] }
  0x8a   : > { %478 = vst [vmem:[#allocation2 + $0x60] sm:$0xff] %v446_v12  ;;  %479 = vst [vmem:[#allocation2 + $0xf0] sm:$0xff] %v447_v13  ;;  %v449_v15 = vld [vmem:[#allocation3 + $0x78] sm:$0xff]  ;;  %v450_v16 = vld [vmem:[#allocation3 + $0x80] sm:$0xff] }
  0x8b   : > { %480 = vst [vmem:[#allocation2 + $0x8] sm:$0xff] %v448_v14  ;;  %v451_v17 = vld [vmem:[#allocation3 + $0x88] sm:$0xff]  ;;  %481 = vst [vmem:[#allocation2 + $0x78] sm:$0xff] %v449_v15  ;;  %v452_v18 = vld [vmem:[#allocation3 + $0x90] sm:$0xff] }
  0x8c   : > { %482 = vst [vmem:[#allocation2 + $0x38] sm:$0xff] %v450_v16  ;;  %483 = vst [vmem:[#allocation2 + $0x58] sm:$0xff] %v451_v17  ;;  %v453_v19 = vld [vmem:[#allocation3 + $0x98] sm:$0xff]  ;;  %v454_v20 = vld [vmem:[#allocation3 + $0xa0] sm:$0xff] }
  0x8d   : > { %484 = vst [vmem:[#allocation2 + $0x40] sm:$0xff] %v452_v18  ;;  %485 = vst [vmem:[#allocation2 + $0xc8] sm:$0xff] %v453_v19  ;;  %v455_v21 = vld [vmem:[#allocation3 + $0xa8] sm:$0xff]  ;;  %v456_v22 = vld [vmem:[#allocation3 + $0xb0] sm:$0xff] }
  0x8e   : > { %486 = vst [vmem:[#allocation2 + $0xe0] sm:$0xff] %v454_v20  ;;  %v457_v23 = vld [vmem:[#allocation3 + $0xb8] sm:$0xff]  ;;  %487 = vst [vmem:[#allocation2 + $0x90] sm:$0xff] %v455_v21  ;;  %v458_v24 = vld [vmem:[#allocation3 + $0xc0] sm:$0xff] }
  0x8f   : > { %488 = vst [vmem:[#allocation2 + $0x70] sm:$0xff] %v456_v22  ;;  %489 = vst [vmem:[#allocation2 + $0xc0] sm:$0xff] %v457_v23  ;;  %v459_v25 = vld [vmem:[#allocation3 + $0xc8] sm:$0xff]  ;;  %v460_v26 = vld [vmem:[#allocation3 + $0xd0] sm:$0xff] }
  0x90   : > { %490 = vst [vmem:[#allocation2 + $0xa8] sm:$0xff] %v458_v24  ;;  %491 = vst [vmem:[#allocation2 + $0xd0] sm:$0xff] %v459_v25  ;;  %v461_v27 = vld [vmem:[#allocation3 + $0xd8] sm:$0xff]  ;;  %v462_v28 = vld [vmem:[#allocation3 + $0xe0] sm:$0xff] }
  0x91   : > { %492 = vst [vmem:[#allocation2 + $0x10] sm:$0xff] %v460_v26  ;;  %v463_v29 = vld [vmem:[#allocation3 + $0xe8] sm:$0xff]  ;;  %493 = vst [vmem:[#allocation2 + $0x28] sm:$0xff] %v461_v27  ;;  %v464_v30 = vld [vmem:[#allocation3 + $0xf0] sm:$0xff] }
  0x92   : > { %494 = vst [vmem:[#allocation2 + $0xa0] sm:$0xff] %v462_v28  ;;  %495 = vst [vmem:[#allocation2 + $0xf8] sm:$0xff] %v463_v29  ;;  %v465_v31 = vld [vmem:[#allocation3 + $0xf8] sm:$0xff] }
  0x93   : > { %496 = vst [vmem:[#allocation2 + $0x20] sm:$0xff] %v464_v30  ;;  %497 = vst [vmem:[#allocation2 + $0x98] sm:$0xff] %v465_v31 }
  0x94 PF: > { %v2981_v32 = vld [vmem:[%s3747_s17 + $0x38] sm:$0xff]   ;;  %v2982_v33 = vld [vmem:[%s3747_s17 + $0x30] sm:$0xff]   ;;  %v2983_v34 = vld [vmem:[%s3747_s17 + $0x28] sm:$0xff]   ;;  %p2484_p7 = scmp.ne.s32.totalorder %s3491_s24, 1 }
  0x95   : > { %2621 = vmatprep.subr.bf16.mxu0 %v2981_v32  ;;  %v2984_v35 = vld [vmem:[%s3747_s17 + $0x20] sm:$0xff]   ;;  %v498_v36 = vld [vmem:[#allocation2 + $0xb0] sm:$0xff]  ;;  %v2985_v39 = vld [vmem:[%s3747_s17 + $0x18] sm:$0xff]  }
  0x96   : > { %2622 = vmatpush3.bf16.msra.mxu0 %v2981_v32  ;;  %v499_v37 = vld [vmem:[#allocation2] sm:$0xff]  ;;  %v2986_v40 = vld [vmem:[%s3747_s17 + $0x10] sm:$0xff]   ;;  %v2987_v41 = vld [vmem:[%s3747_s17 + $0x8] sm:$0xff]  }
  0x97   : > { %2623 = vmatprep.subr.bf16.mxu0 %v2982_v33  ;;  %v3772_v38 = vpack.c.bf16 %v499_v37, %v498_v36  ;;  %v2989_v42 = vld [vmem:[%s3753_s3 + $0x38] sm:$0xff]   ;;  %v2988_v43 = vld [vmem:[%s3747_s17] sm:$0xff]   ;;  %v502_v46 = vld [vmem:[#allocation2 + $0x50] sm:$0xff] }
  0x98   : > { %2669 = vmatprep.subr.bf16.mxu1 %v2989_v42  ;;  %v500_v44 = vld [vmem:[#allocation2 + $0xd8] sm:$0xff]  ;;  %v503_v47 = vld [vmem:[#allocation2 + $0x68] sm:$0xff]  ;;  %v504_v50 = vld [vmem:[#allocation2 + $0x30] sm:$0xff] }
  0x99   : > { %2637 = vmatprep.mubr.bf16.mxu0 %v3772_v38  ;;  %2670 = vmatpush3.bf16.msra.mxu1 %v2989_v42  ;;  %v501_v45 = vld [vmem:[#allocation2 + $0x18] sm:$0xff]  ;;  %v3782_v49 = vpack.c.bf16 %v503_v47, %v502_v46  ;;  %v505_v51 = vld [vmem:[#allocation2 + $0x48] sm:$0xff]  ;;  %v506_v52 = vld [vmem:[#allocation2 + $0x80] sm:$0xff] }
  0x9a   : > { %2624 = vmatpush3.bf16.msra.mxu0 %v2982_v33  ;;  %v3780_v48 = vpack.c.bf16 %v501_v45, %v500_v44  ;;  %v507_v53 = vld [vmem:[#allocation2 + $0x88] sm:$0xff]  ;;  %v3786_v54 = vpack.c.bf16 %v505_v51, %v504_v50  ;;  %v509_v57 = vld [vmem:[#allocation2 + $0xb8] sm:$0xff]  ;;  %v510_v58 = vld [vmem:[#allocation2 + $0x60] sm:$0xff] }
  0x9b   : > { %2625 = vmatprep.subr.bf16.mxu0 %v2983_v34  ;;  %v3788_v55 = vpack.c.bf16 %v507_v53, %v506_v52  ;;  %v508_v56 = vld [vmem:[#allocation2 + $0xe8] sm:$0xff]  ;;  %v511_v59 = vld [vmem:[#allocation2 + $0xf0] sm:$0xff]  ;;  %v513_v63 = vld [vmem:[#allocation2 + $0x78] sm:$0xff] }
  0x9c   : > { %v3792_v60 = vpack.c.bf16 %v509_v57, %v508_v56  ;;  %v3794_v61 = vpack.c.bf16 %v511_v59, %v510_v58  ;;  %v512_v62 = vld [vmem:[#allocation2 + $0x8] sm:$0xff]  ;;  %v514_v0 = vld [vmem:[#allocation2 + $0x38] sm:$0xff]  ;;  %v516_v4 = vld [vmem:[#allocation2 + $0x40] sm:$0xff] }
  0x9d   : > { %v515_v1 = vld [vmem:[#allocation2 + $0x58] sm:$0xff]  ;;  %v3798_v2 = vpack.c.bf16 %v513_v63, %v512_v62  ;;  %v517_v5 = vld [vmem:[#allocation2 + $0xc8] sm:$0xff]  ;;  %v518_v6 = vld [vmem:[#allocation2 + $0xe0] sm:$0xff] }
  0x9e   : > { %2626 = vmatpush3.bf16.msra.mxu0 %v2983_v34  ;;  %v3800_v3 = vpack.c.bf16 %v515_v1, %v514_v0  ;;  %v519_v7 = vld [vmem:[#allocation2 + $0x90] sm:$0xff]  ;;  %v3804_v8 = vpack.c.bf16 %v517_v5, %v516_v4  ;;  %v521_v11 = vld [vmem:[#allocation2 + $0xc0] sm:$0xff]  ;;  %v522_v12 = vld [vmem:[#allocation2 + $0xa8] sm:$0xff] }
  0x9f   : > { %2627 = vmatprep.subr.bf16.mxu0 %v2984_v35  ;;  %v3806_v9 = vpack.c.bf16 %v519_v7, %v518_v6  ;;  %v520_v10 = vld [vmem:[#allocation2 + $0x70] sm:$0xff]  ;;  %v525_v17 = vld [vmem:[#allocation2 + $0x28] sm:$0xff]  ;;  %v526_v18 = vld [vmem:[#allocation2 + $0xa0] sm:$0xff] }
  0xa0   : > { %v523_v13 = vld [vmem:[#allocation2 + $0xd0] sm:$0xff]  ;;  %v3810_v14 = vpack.c.bf16 %v521_v11, %v520_v10  ;;  %v527_v19 = vld [vmem:[#allocation2 + $0xf8] sm:$0xff]  ;;  %v528_v22 = vld [vmem:[#allocation2 + $0x20] sm:$0xff] }
  0xa1   : > { %v3812_v15 = vpack.c.bf16 %v523_v13, %v522_v12  ;;  %v524_v16 = vld [vmem:[#allocation2 + $0x10] sm:$0xff]  ;;  %v3818_v21 = vpack.c.bf16 %v527_v19, %v526_v18  ;;  %v529_v23 = vld [vmem:[#allocation2 + $0x98] sm:$0xff]  ;;  %v2991_v26 = vld [vmem:[%s3753_s3 + $0x28] sm:$0xff]  }
  0xa2   : > { %2628 = vmatpush3.bf16.msra.mxu0 %v2984_v35  ;;  %v3816_v20 = vpack.c.bf16 %v525_v17, %v524_v16  ;;  %v3822_v24 = vpack.c.bf16 %v529_v23, %v528_v22  ;;  %v2990_v25 = vld [vmem:[%s3753_s3 + $0x30] sm:$0xff]   ;;  %v2992_v27 = vld [vmem:[%s3753_s3 + $0x20] sm:$0xff]   ;;  %v2993_v28 = vld [vmem:[%s3753_s3 + $0x18] sm:$0xff]  }
  0xa3   : > { %2629 = vmatprep.subr.bf16.mxu0 %v2985_v39  ;;  %2671 = vmatprep.subr.bf16.mxu1 %v2990_v25  ;;  %v2994_v29 = vld [vmem:[%s3753_s3 + $0x10] sm:$0xff]   ;;  %v2995_v30 = vld [vmem:[%s3753_s3 + $0x8] sm:$0xff]   ;;  %v2996_v31 = vld [vmem:[%s3753_s3] sm:$0xff]  }
  0xa4   : > { %2672 = vmatpush3.bf16.msra.mxu1 %v2990_v25  ;;  %v2997_v32 = vld [vmem:[%s3761_s29 + $0x38] sm:$0xff]   ;;  %v2999_v34 = vld [vmem:[%s3761_s29 + $0x30] sm:$0xff]   ;;  %v3001_v35 = vld [vmem:[%s3761_s29 + $0x28] sm:$0xff]  }
  0xa5   : > { %2673 = vmatprep.subr.bf16.mxu1 %v2991_v26  ;;  %v3835_v33 = vld [vmem:[%s3755_s30 + $0x38] sm:$0xff]   ;;  %v3003_v36 = vld [vmem:[%s3761_s29 + $0x20] sm:$0xff]  }
  0xa6   : > { %2630 = vmatpush3.bf16.msra.mxu0 %v2985_v39  ;;  %v3005_v37 = vld [vmem:[%s3761_s29 + $0x18] sm:$0xff]   ;;  %v3009_v39 = vld [vmem:[%s3761_s29 + $0x8] sm:$0xff]  }
  0xa7   : > { %2631 = vmatprep.subr.bf16.mxu0 %v2986_v40 }
  0xa8   : > { %2674 = vmatpush3.bf16.msra.mxu1 %v2991_v26 }
  0xa9   : > { %2675 = vmatprep.subr.bf16.mxu1 %v2992_v27 }
  0xaa   : > { %2632 = vmatpush3.bf16.msra.mxu0 %v2986_v40 }
  0xab   : > { %2633 = vmatprep.subr.bf16.mxu0 %v2987_v41 }
  0xac   : > { %2676 = vmatpush3.bf16.msra.mxu1 %v2992_v27 }
  0xad   : > { %2677 = vmatprep.subr.bf16.mxu1 %v2993_v28 }
  0xae   : > { %2634 = vmatpush3.bf16.msra.mxu0 %v2987_v41 }
  0xaf   : > { %2635 = vmatprep.subr.bf16.mxu0 %v2988_v43 }
  0xb0   : > { %2678 = vmatpush3.bf16.msra.mxu1 %v2993_v28 }
  0xb1   : > { %2679 = vmatprep.subr.bf16.mxu1 %v2994_v29 }
  0xb2   : > { %2636 = vmatpush3.bf16.msra.mxu0 %v2988_v43 }
  0xb3   : > { %2717 = vmatprep.subr.bf16.mxu0 %v2997_v32 }
  0xb4   : > { %2680 = vmatpush3.bf16.msra.mxu1 %v2994_v29 }
  0xb5   : > { %2638 = vmatmul.mubr.bf16.vlgmr.msra.gmra.mxu0 %v3780_v48  ;;  %2681 = vmatprep.subr.bf16.mxu1 %v2995_v30 }
  0xb6   : > { %2641 = vmatprep.mubr.bf16.mxu0 %v3782_v49  ;;  %2718 = vmatpush3.bf16.msra.mxu0 %v2997_v32 }
  0xb7   : > { %2719 = vmatprep.subr.bf16.mxu0 %v2999_v34 }
  0xb8   : > { %2682 = vmatpush3.bf16.msra.mxu1 %v2995_v30 }
  0xb9   : > { %2683 = vmatprep.subr.bf16.mxu1 %v2996_v31 }
  0xba   : > { %2720 = vmatpush3.bf16.msra.mxu0 %v2999_v34 }
  0xbb   : > { %2721 = vmatprep.subr.bf16.mxu0 %v3001_v35 }
  0xbc   : > { %2684 = vmatpush3.bf16.msra.mxu1 %v2996_v31 }
  0xbd   : > { %2642 = vmatmul.mubr.bf16.gmra.mxu0 %v3786_v54  ;;  %2765 = vmatprep.subr.bf16.mxu1 %v3835_v33 }
  0xbe   : > { %2645 = vmatprep.mubr.bf16.mxu0 %v3788_v55  ;;  %2722 = vmatpush3.bf16.msra.mxu0 %v3001_v35 }
  0xbf   : > { %2723 = vmatprep.subr.bf16.mxu0 %v3003_v36 }
  0xc2   : > { %2724 = vmatpush3.bf16.msra.mxu0 %v3003_v36 }
  0xc3   : > { %2725 = vmatprep.subr.bf16.mxu0 %v3005_v37 }
  0xc5   : > { %2646 = vmatmul.mubr.bf16.gmra.mxu0 %v3792_v60 }
  0xc6   : > { %2649 = vmatprep.mubr.bf16.mxu0 %v3794_v61  ;;  %2726 = vmatpush3.bf16.msra.mxu0 %v3005_v37 }
  0xcd   : > { %2650 = vmatmul.mubr.bf16.gmra.mxu0 %v3798_v2 }
  0xce   : > { %2653 = vmatprep.mubr.bf16.mxu0 %v3800_v3 }
  0xd5   : > { %2654 = vmatmul.mubr.bf16.gmra.mxu0 %v3804_v8 }
  0xd6   : > { %2657 = vmatprep.mubr.bf16.mxu0 %v3806_v9 }
  0xdd   : > { %2658 = vmatmul.mubr.bf16.gmra.mxu0 %v3810_v14 }
  0xde   : > { %2661 = vmatprep.mubr.bf16.mxu0 %v3812_v15 }
  0xe5   : > { %2662 = vmatmul.mubr.bf16.gmra.mxu0 %v3816_v20 }
  0xe6   : > { %2665 = vmatprep.mubr.bf16.mxu0 %v3818_v21 }
  0xed   : > { %2666 = vmatmul.mubr.bf16.gmra.mxu0 %v3822_v24 }
  0xee   : > { %2733 = vmatprep.mubr.bf16.mxu0 %v3772_v38  ;;  %v3007_v38 = vld [vmem:[%s3761_s29 + $0x10] sm:$0xff]  }
  0xef   : > { %2727 = vmatprep.subr.bf16.mxu0 %v3007_v38 }
  0xf0   : > { %2728 = vmatpush3.bf16.msra.mxu0 %v3007_v38 }
  0xf1   : > { %2729 = vmatprep.subr.bf16.mxu0 %v3009_v39 }
  0xf4   : > { %2730 = vmatpush3.bf16.msra.mxu0 %v3009_v39 }
 0x175   : > { %v2639_v40 = vpop.f32.mrf.mxu0 }
 0x176   : > { %v805_v41 = vmul.f32 0.70710677, %v2639_v40  ;;  %v773_v27 = vmul.f32 0.5, %v2639_v40 }
 0x177   : > { %v644_v42 = vpop.f32.mrf.mxu0 }
 0x178   : > { %v803_v43 = vmul.f32 0.70710677, %v644_v42  ;;  %3013 = verf.f32 %v805_v41  ;;  %v771_v22 = vmul.f32 0.5, %v644_v42 }
 0x179   : > { %v2640_v44 = vpop.f32.mrf.mxu0 }
 0x17a   : > { %v806_v45 = vmul.f32 0.70710677, %v2640_v44  ;;  %3015 = verf.f32 %v803_v43  ;;  %v774_v18 = vmul.f32 0.5, %v2640_v44  ;;  %v3000_v44 = vld [vmem:[%s3755_s30 + $0x30] sm:$0xff]  }
 0x17b   : > { %v647_v46 = vpop.f32.mrf.mxu0 }
 0x17c   : > { %3017 = verf.f32 %v806_v45  ;;  %v804_v47 = vmul.f32 0.70710677, %v647_v46  ;;  %v772_v23 = vmul.f32 0.5, %v647_v46 }
 0x17d   : > { %v3844_v50 = vpop.f32.mrf.mxu0 }
 0x17e   : > { %3019 = verf.f32 %v804_v47  ;;  %v809_v51 = vmul.f32 0.70710677, %v3844_v50 }
 0x17f   : > { %v660_v52 = vpop.f32.mrf.mxu0 }
 0x180   : > { %v807_v53 = vmul.f32 0.70710677, %v660_v52  ;;  %3021 = verf.f32 %v809_v51 }
 0x181   : > { %v2644_v56 = vpop.f32.mrf.mxu0 }
 0x182   : > { %v810_v57 = vmul.f32 0.70710677, %v2644_v56  ;;  %3023 = verf.f32 %v807_v53  ;;  %v778_v47 = vmul.f32 0.5, %v2644_v56 }
 0x183   : > { %v663_v58 = vpop.f32.mrf.mxu0 }
 0x184   : > { %3025 = verf.f32 %v810_v57  ;;  %v808_v59 = vmul.f32 0.70710677, %v663_v58  ;;  %v776_v57 = vmul.f32 0.5, %v663_v58 }
 0x185   : > { %v3847_v62 = vpop.f32.mrf.mxu0  ;;  %v3014_v0 = vpop.eup %3013 }
 0x186   : > { %3027 = verf.f32 %v808_v59  ;;  %v813_v63 = vmul.f32 0.70710677, %v3847_v62  ;;  %v869_v17 = vadd.f32 1.0, %v3014_v0 }
 0x187   : > { %v3850_v1 = vpop.f32.mrf.mxu0  ;;  %v3016_v4 = vpop.eup %3015 }
 0x188   : > { %v811_v5 = vmul.f32 0.70710677, %v3850_v1  ;;  %3029 = verf.f32 %v813_v63  ;;  %v867_v16 = vadd.f32 1.0, %v3016_v4  ;;  %v901_v36 = vmul.f32 %v869_v17, %v773_v27  ;;  %v3004_v27 = vld [vmem:[%s3755_s30 + $0x20] sm:$0xff]  }
 0x189   : > { %v3018_v6 = vpop.eup %3017  ;;  %v3853_v7 = vpop.f32.mrf.mxu0  ;;  %v775_v63 = vmul.f32 0.5, %v660_v52 }
 0x18a   : > { %v870_v10 = vadd.f32 1.0, %v3018_v6  ;;  %v814_v11 = vmul.f32 0.70710677, %v3853_v7  ;;  %3031 = verf.f32 %v811_v5  ;;  %v899_v32 = vmul.f32 %v867_v16, %v771_v22 }
 0x18b   : > { %v3020_v12 = vpop.eup %3019  ;;  %v3856_v13 = vpop.f32.mrf.mxu0  ;;  %v777_v5 = vmul.f32 0.5, %v3844_v50 }
 0x18c   : > { %3033 = verf.f32 %v814_v11  ;;  %v812_v19 = vmul.f32 0.70710677, %v3856_v13  ;;  %v868_v26 = vadd.f32 1.0, %v3020_v12  ;;  %v902_v28 = vmul.f32 %v870_v10, %v774_v18  ;;  %v3002_v11 = vld [vmem:[%s3755_s30 + $0x28] sm:$0xff]  }
 0x18d   : > { %v3859_v25 = vpop.f32.mrf.mxu0  ;;  %v3022_v30 = vpop.eup %3021 }
 0x18e   : > { %3035 = verf.f32 %v812_v19  ;;  %v817_v29 = vmul.f32 0.70710677, %v3859_v25  ;;  %v900_v34 = vmul.f32 %v868_v26, %v772_v23  ;;  %v932_v43 = vpack.c.bf16 %v902_v28, %v901_v36 }
 0x18f   : > { %v3862_v31 = vpop.f32.mrf.mxu0  ;;  %v3024_v35 = vpop.eup %3023  ;;  %v873_v53 = vadd.f32 1.0, %v3022_v30  ;;  %v782_v30 = vmul.f32 0.5, %v3853_v7  ;;  %v781_v7 = vmul.f32 0.5, %v3847_v62 }
 0x190   : > { %v815_v38 = vmul.f32 0.70710677, %v3862_v31  ;;  %v931_v41 = vpack.c.bf16 %v900_v34, %v899_v32  ;;  %3037 = verf.f32 %v817_v29  ;;  %v871_v46 = vadd.f32 1.0, %v3024_v35 }
 0x191   : > { %v3026_v37 = vpop.eup %3025  ;;  %v3865_v39 = vpop.f32.mrf.mxu0  ;;  %v905_v17 = vmul.f32 %v873_v53, %v777_v5  ;;  %v780_v35 = vmul.f32 0.5, %v3856_v13 }
 0x192   : > { %v874_v42 = vadd.f32 1.0, %v3026_v37  ;;  %v818_v40 = vmul.f32 0.70710677, %v3865_v39  ;;  %3039 = verf.f32 %v815_v38  ;;  %2685 = vmatprep.mubr.bf16.mxu1 %v931_v41  ;;  %v903_v58 = vmul.f32 %v871_v46, %v775_v63 }
 0x193   : > { %v3028_v45 = vpop.eup %3027  ;;  %v3869_v51 = vpop.f32.mrf.mxu0  ;;  %2686 = vmatmul.mubr.bf16.vlgmr.msra.gmra.mxu1 %v932_v43  ;;  %v779_v37 = vmul.f32 0.5, %v3850_v1  ;;  %v3006_v43 = vld [vmem:[%s3755_s30 + $0x18] sm:$0xff]  }
 0x194   : > { %v872_v59 = vadd.f32 1.0, %v3028_v45  ;;  %3041 = verf.f32 %v818_v40  ;;  %v816_v0 = vmul.f32 0.70710677, %v3869_v51  ;;  %2766 = vmatpush3.bf16.msra.mxu1 %v3835_v33  ;;  %v906_v56 = vmul.f32 %v874_v42, %v778_v47 }
 0x195   : > { %v3872_v4 = vpop.f32.mrf.mxu0  ;;  %2767 = vmatprep.subr.bf16.mxu1 %v3000_v44  ;;  %v3030_v12 = vpop.eup %3029 }
 0x196   : > { %v904_v6 = vmul.f32 %v872_v59, %v776_v57  ;;  %v821_v10 = vmul.f32 0.70710677, %v3872_v4  ;;  %3043 = verf.f32 %v816_v0  ;;  %v934_v26 = vpack.c.bf16 %v906_v56, %v905_v17  ;;  %v3008_v56 = vld [vmem:[%s3755_s30 + $0x10] sm:$0xff]  }
 0x197   : > { %v3878_v16 = vpop.f32.mrf.mxu0  ;;  %v3032_v52 = vpop.eup %3031  ;;  %v877_v34 = vadd.f32 1.0, %v3030_v12  ;;  %v783_v17 = vmul.f32 0.5, %v3862_v31 }
 0x198   : > { %v819_v19 = vmul.f32 0.70710677, %v3878_v16  ;;  %v933_v50 = vpack.c.bf16 %v904_v6, %v903_v58  ;;  %2768 = vmatpush3.bf16.msra.mxu1 %v3000_v44  ;;  %3045 = verf.f32 %v821_v10  ;;  %v875_v29 = vadd.f32 1.0, %v3032_v52 }
 0x199   : > { %v3034_v18 = vpop.eup %3033  ;;  %v3881_v33 = vpop.f32.mrf.mxu0  ;;  %2769 = vmatprep.subr.bf16.mxu1 %v3002_v11  ;;  %v909_v47 = vmul.f32 %v877_v34, %v781_v7  ;;  %v786_v58 = vmul.f32 0.5, %v3865_v39 }
 0x19a   : > { %v878_v22 = vadd.f32 1.0, %v3034_v18  ;;  %v822_v23 = vmul.f32 0.70710677, %v3881_v33  ;;  %3047 = verf.f32 %v819_v19  ;;  %2689 = vmatprep.mubr.bf16.mxu1 %v933_v50  ;;  %v907_v45 = vmul.f32 %v875_v29, %v779_v37 }
 0x19b   : > { %v3036_v28 = vpop.eup %3035  ;;  %v3886_v32 = vpop.f32.mrf.mxu0  ;;  %2690 = vmatmul.mubr.bf16.gmra.mxu1 %v934_v26  ;;  %v784_v18 = vmul.f32 0.5, %v3869_v51  ;;  %v3010_v26 = vld [vmem:[%s3755_s30 + $0x8] sm:$0xff]  }
 0x19c   : > { %v876_v36 = vadd.f32 1.0, %v3036_v28  ;;  %3049 = verf.f32 %v822_v23  ;;  %v820_v38 = vmul.f32 0.70710677, %v3886_v32  ;;  %2770 = vmatpush3.bf16.msra.mxu1 %v3002_v11  ;;  %v910_v42 = vmul.f32 %v878_v22, %v782_v30 }
 0x19d   : > { %v3891_v41 = vpop.f32.mrf.mxu0  ;;  %2771 = vmatprep.subr.bf16.mxu1 %v3004_v27  ;;  %v3038_v44 = vpop.eup %3037  ;;  %v785_v22 = vmul.f32 0.5, %v3859_v25 }
 0x19e   : > { %v908_v40 = vmul.f32 %v876_v36, %v780_v35  ;;  %3051 = verf.f32 %v820_v38  ;;  %v825_v13 = vmul.f32 0.70710677, %v3891_v41  ;;  %v936_v5 = vpack.c.bf16 %v910_v42, %v909_v47 }
 0x19f   : > { %v3896_v46 = vpop.f32.mrf.mxu0  ;;  %v3040_v1 = vpop.eup %3039  ;;  %v881_v12 = vadd.f32 1.0, %v3038_v44  ;;  %v787_v47 = vmul.f32 0.5, %v3878_v16 }
 0x1a0   : > { %v823_v53 = vmul.f32 0.70710677, %v3896_v46  ;;  %v935_v62 = vpack.c.bf16 %v908_v40, %v907_v45  ;;  %2772 = vmatpush3.bf16.msra.mxu1 %v3004_v27  ;;  %v879_v6 = vadd.f32 1.0, %v3040_v1 }
 0x1a1   : > { %v3042_v57 = vpop.eup %3041  ;;  %v3899_v59 = vpop.f32.mrf.mxu0  ;;  %2773 = vmatprep.subr.bf16.mxu1 %v3006_v43  ;;  %v913_v34 = vmul.f32 %v881_v12, %v785_v22 }
 0x1a2   : > { %v882_v63 = vadd.f32 1.0, %v3042_v57  ;;  %3053 = verf.f32 %v823_v53  ;;  %v826_v0 = vmul.f32 0.70710677, %v3899_v59  ;;  %2693 = vmatprep.mubr.bf16.mxu1 %v935_v62  ;;  %v911_v39 = vmul.f32 %v879_v6, %v783_v17 }
 0x1a3   : > { %3055 = verf.f32 %v825_v13  ;;  %v3903_v10 = vpop.f32.mrf.mxu0  ;;  %v3044_v11 = vpop.eup %3043  ;;  %2694 = vmatmul.mubr.bf16.gmra.mxu1 %v936_v5  ;;  %v789_v13 = vmul.f32 0.5, %v3872_v4  ;;  %v788_v57 = vmul.f32 0.5, %v3886_v32 }
 0x1a4   : > { %3057 = verf.f32 %v826_v0  ;;  %v824_v52 = vmul.f32 0.70710677, %v3903_v10  ;;  %v880_v19 = vadd.f32 1.0, %v3044_v11  ;;  %2774 = vmatpush3.bf16.msra.mxu1 %v3006_v43  ;;  %v914_v23 = vmul.f32 %v882_v63, %v786_v58 }
 0x1a5   : > { %v3909_v50 = vpop.f32.mrf.mxu0  ;;  %2775 = vmatprep.subr.bf16.mxu1 %v3008_v56  ;;  %v3046_v27 = vpop.eup %3045  ;;  %v790_v43 = vmul.f32 0.5, %v3881_v33 }
 0x1a6   : > { %3059 = verf.f32 %v824_v52  ;;  %v912_v28 = vmul.f32 %v880_v19, %v784_v18  ;;  %v829_v29 = vmul.f32 0.70710677, %v3909_v50  ;;  %v938_v7 = vpack.c.bf16 %v914_v23, %v913_v34 }
 0x1a7   : > { %v3914_v30 = vpop.f32.mrf.mxu0  ;;  %v3048_v31 = vpop.eup %3047  ;;  %v885_v42 = vadd.f32 1.0, %v3046_v27  ;;  %v791_v23 = vmul.f32 0.5, %v3896_v46  ;;  %v793_v34 = vmul.f32 0.5, %v3891_v41 }
 0x1a8   : > { %v827_v51 = vmul.f32 0.70710677, %v3914_v30  ;;  %v937_v37 = vpack.c.bf16 %v912_v28, %v911_v39  ;;  %2776 = vmatpush3.bf16.msra.mxu1 %v3008_v56  ;;  %v883_v40 = vadd.f32 1.0, %v3048_v31  ;;  %v792_v28 = vmul.f32 0.5, %v3903_v10 }
 0x1a9   : > { %v3050_v35 = vpop.eup %3049  ;;  %v3917_v36 = vpop.f32.mrf.mxu0  ;;  %2777 = vmatprep.subr.bf16.mxu1 %v3010_v26  ;;  %v917_v5 = vmul.f32 %v885_v42, %v789_v13 }
 0x1aa   : > { %v886_v25 = vadd.f32 1.0, %v3050_v35  ;;  %3061 = verf.f32 %v827_v51  ;;  %v830_v38 = vmul.f32 0.70710677, %v3917_v36  ;;  %2697 = vmatprep.mubr.bf16.mxu1 %v937_v37  ;;  %v915_v56 = vmul.f32 %v883_v40, %v787_v47 }
 0x1ab   : > { %3063 = verf.f32 %v829_v29  ;;  %v743_v44 = vpop.f32.mrf.mxu0  ;;  %v3052_v45 = vpop.eup %3051  ;;  %2698 = vmatmul.mubr.bf16.gmra.mxu1 %v938_v7 }
 0x1ac   : > { %3065 = verf.f32 %v830_v38  ;;  %v828_v1 = vmul.f32 0.70710677, %v743_v44  ;;  %v918_v53 = vmul.f32 %v886_v25, %v790_v43  ;;  %v884_v62 = vadd.f32 1.0, %v3052_v45  ;;  %2778 = vmatpush3.bf16.msra.mxu1 %v3010_v26 }
 0x1ad   : > { %v3924_v63 = vpop.f32.mrf.mxu0  ;;  %v794_v26 = vmul.f32 0.5, %v3899_v59  ;;  %v795_v45 = vmul.f32 0.5, %v3914_v30  ;;  %v796_v41 = vmul.f32 0.5, %v743_v44 }
 0x1ae   : > { %3067 = verf.f32 %v828_v1  ;;  %v833_v33 = vmul.f32 0.70710677, %v3924_v63  ;;  %v916_v6 = vmul.f32 %v884_v62, %v788_v57  ;;  %v940_v17 = vpack.c.bf16 %v918_v53, %v917_v5 }
 0x1af   : > { %v3054_v0 = vpop.eup %3053  ;;  %v756_v4 = vpop.f32.mrf.mxu0  ;;  %v798_v1 = vmul.f32 0.5, %v3917_v36  ;;  %v797_v53 = vmul.f32 0.5, %v3909_v50 }
 0x1b0   : > { %v3056_v11 = vpop.eup %3055  ;;  %v831_v58 = vmul.f32 0.70710677, %v756_v4  ;;  %v939_v16 = vpack.c.bf16 %v916_v6, %v915_v56  ;;  %v887_v18 = vadd.f32 1.0, %v3054_v0  ;;  %3069 = verf.f32 %v833_v33 }
 0x1b1   : > { %v3058_v12 = vpop.eup %3057  ;;  %v2668_v52 = vpop.f32.mrf.mxu0  ;;  %v889_v39 = vadd.f32 1.0, %v3056_v11 }
 0x1b2   : > { %v890_v32 = vadd.f32 1.0, %v3058_v12  ;;  %v834_v19 = vmul.f32 0.70710677, %v2668_v52  ;;  %3071 = verf.f32 %v831_v58  ;;  %2701 = vmatprep.mubr.bf16.mxu1 %v939_v16  ;;  %v919_v51 = vmul.f32 %v887_v18, %v791_v23 }
 0x1b3   : > { %v3060_v22 = vpop.eup %3059  ;;  %v759_v27 = vpop.f32.mrf.mxu0  ;;  %2702 = vmatmul.mubr.bf16.gmra.mxu1 %v940_v17  ;;  %v921_v38 = vmul.f32 %v889_v39, %v793_v34  ;;  %v802_v44 = vmul.f32 0.5, %v2668_v52  ;;  %v799_v17 = vmul.f32 0.5, %v756_v4 }
 0x1b4   : > { %v888_v29 = vadd.f32 1.0, %v3060_v22  ;;  %3073 = verf.f32 %v834_v19  ;;  %v832_v31 = vmul.f32 0.70710677, %v759_v27  ;;  %v922_v35 = vmul.f32 %v890_v32, %v794_v26 }
 0x1b5   : > { %v800_v50 = vmul.f32 0.5, %v759_v27  ;;  %v801_v32 = vmul.f32 0.5, %v3924_v63 }
 0x1b6   : > { %v920_v37 = vmul.f32 %v888_v29, %v792_v28  ;;  %3075 = verf.f32 %v832_v31  ;;  %v942_v43 = vpack.c.bf16 %v922_v35, %v921_v38  ;;  %v3011_v29 = vld [vmem:[%s3761_s29] sm:$0xff]  }
 0x1b7   : > { %v3062_v25 = vpop.eup %3061  ;;  %2731 = vmatprep.subr.bf16.mxu0 %v3011_v29  ;;  %v3012_v31 = vld [vmem:[%s3755_s30] sm:$0xff]  }
 0x1b8   : > { %v3064_v46 = vpop.eup %3063  ;;  %v941_v59 = vpack.c.bf16 %v920_v37, %v919_v51  ;;  %v891_v42 = vadd.f32 1.0, %v3062_v25  ;;  %2732 = vmatpush3.bf16.msra.mxu0 %v3011_v29  ;;  %2779 = vmatprep.subr.bf16.mxu1 %v3012_v31 }
 0x1b9   : > { %v3066_v7 = vpop.eup %3065  ;;  %v893_v13 = vadd.f32 1.0, %v3064_v46  ;;  %2780 = vmatpush3.bf16.msra.mxu1 %v3012_v31 }
 0x1ba   : > { %v894_v40 = vadd.f32 1.0, %v3066_v7  ;;  %2705 = vmatprep.mubr.bf16.mxu1 %v941_v59  ;;  %v923_v57 = vmul.f32 %v891_v42, %v795_v45 }
 0x1bb   : > { %v3068_v10 = vpop.eup %3067  ;;  %2706 = vmatmul.mubr.bf16.gmra.mxu1 %v942_v43  ;;  %v925_v56 = vmul.f32 %v893_v13, %v797_v53  ;;  %2734 = vmatmul.mubr.bf16.vlgmr.msra.gmra.mxu0 %v3780_v48 }
 0x1bc   : > { %v892_v47 = vadd.f32 1.0, %v3068_v10  ;;  %v926_v62 = vmul.f32 %v894_v40, %v798_v1  ;;  %2737 = vmatprep.mubr.bf16.mxu0 %v3782_v49 }
 0x1bd   : > { %v3070_v0 = vpop.eup %3069 }
 0x1be   : > { %v924_v33 = vmul.f32 %v892_v47, %v796_v41  ;;  %v944_v58 = vpack.c.bf16 %v926_v62, %v925_v56  ;;  %v897_v36 = vadd.f32 1.0, %v3070_v0 }
 0x1bf   : > { %v3072_v5 = vpop.eup %3071 }
 0x1c0   : > { %v943_v6 = vpack.c.bf16 %v924_v33, %v923_v57  ;;  %v895_v30 = vadd.f32 1.0, %v3072_v5  ;;  %v929_v26 = vmul.f32 %v897_v36, %v801_v32 }
 0x1c1   : > { %v3074_v11 = vpop.eup %3073 }
 0x1c2   : > { %v898_v12 = vadd.f32 1.0, %v3074_v11  ;;  %2709 = vmatprep.mubr.bf16.mxu1 %v943_v6  ;;  %v927_v22 = vmul.f32 %v895_v30, %v799_v17 }
 0x1c3   : > { %v3076_v16 = vpop.eup %3075  ;;  %2710 = vmatmul.mubr.bf16.gmra.mxu1 %v944_v58  ;;  %2738 = vmatmul.mubr.bf16.gmra.mxu0 %v3786_v54 }
 0x1c4   : > { %v896_v18 = vadd.f32 1.0, %v3076_v16  ;;  %v930_v19 = vmul.f32 %v898_v12, %v802_v44  ;;  %2741 = vmatprep.mubr.bf16.mxu0 %v3788_v55 }
 0x1c6   : > { %v928_v23 = vmul.f32 %v896_v18, %v800_v50  ;;  %v946_v28 = vpack.c.bf16 %v930_v19, %v929_v26 }
 0x1c8   : > { %v945_v39 = vpack.c.bf16 %v928_v23, %v927_v22 }
 0x1ca   : > { %2713 = vmatprep.mubr.bf16.mxu1 %v945_v39 }
 0x1cb   : > { %2714 = vmatmul.mubr.bf16.gmra.mxu1 %v946_v28  ;;  %2742 = vmatmul.mubr.bf16.gmra.mxu0 %v3792_v60 }
 0x1cc   : > { %2745 = vmatprep.mubr.bf16.mxu0 %v3794_v61 }
 0x1d3   : > { %2746 = vmatmul.mubr.bf16.gmra.mxu0 %v3798_v2 }
 0x1d4   : > { %2749 = vmatprep.mubr.bf16.mxu0 %v3800_v3 }
 0x1db   : > { %2750 = vmatmul.mubr.bf16.gmra.mxu0 %v3804_v8 }
 0x1dc   : > { %2753 = vmatprep.mubr.bf16.mxu0 %v3806_v9 }
 0x1e3   : > { %2754 = vmatmul.mubr.bf16.gmra.mxu0 %v3810_v14 }
 0x1e4   : > { %2757 = vmatprep.mubr.bf16.mxu0 %v3812_v15 }
 0x1eb   : > { %2758 = vmatmul.mubr.bf16.gmra.mxu0 %v3816_v20 }
 0x1ec   : > { %2761 = vmatprep.mubr.bf16.mxu0 %v3818_v21 }
 0x1f3   : > { %2762 = vmatmul.mubr.bf16.gmra.mxu0 %v3822_v24 }
 0x253   : > { %v3952_v48 = vpop.f32.mrf.mxu1 }
 0x255   : > { %v3954_v49 = vpop.f32.mrf.mxu1 }
 0x257   : > { %v3956_v54 = vpop.f32.mrf.mxu1 }
 0x258   : > { %v1173_v61 = vpack.c.bf16 %v3956_v54, %v3952_v48 }
 0x259   : > { %v3958_v55 = vpop.f32.mrf.mxu1 }
 0x25a   : > { %v1172_v60 = vpack.c.bf16 %v3958_v55, %v3954_v49 }
 0x25b   : > { %v3964_v2 = vpop.f32.mrf.mxu1 }
 0x25c   : > { %2781 = vmatprep.mubr.bf16.mxu1 %v1172_v60 }
 0x25d   : > { %v3966_v3 = vpop.f32.mrf.mxu1  ;;  %2782 = vmatmul.mubr.bf16.vlgmr.msra.gmra.mxu1 %v1173_v61 }
 0x25f   : > { %v3968_v8 = vpop.f32.mrf.mxu1 }
 0x260   : > { %v1175_v15 = vpack.c.bf16 %v3968_v8, %v3964_v2 }
 0x261   : > { %v3970_v9 = vpop.f32.mrf.mxu1 }
 0x262   : > { %v1174_v14 = vpack.c.bf16 %v3970_v9, %v3966_v3 }
 0x263   : > { %v3976_v20 = vpop.f32.mrf.mxu1 }
 0x264   : > { %2785 = vmatprep.mubr.bf16.mxu1 %v1174_v14 }
 0x265   : > { %v3978_v21 = vpop.f32.mrf.mxu1  ;;  %2786 = vmatmul.mubr.bf16.gmra.mxu1 %v1175_v15 }
 0x267   : > { %v3980_v24 = vpop.f32.mrf.mxu1 }
 0x268   : > { %v1177_v52 = vpack.c.bf16 %v3980_v24, %v3976_v20 }
 0x269   : > { %v3982_v63 = vpop.f32.mrf.mxu1 }
 0x26a   : > { %v1176_v4 = vpack.c.bf16 %v3982_v63, %v3978_v21 }
 0x26b   : > { %v3988_v27 = vpop.f32.mrf.mxu1 }
 0x26c   : > { %2789 = vmatprep.mubr.bf16.mxu1 %v1176_v4 }
 0x26d   : > { %v3990_v34 = vpop.f32.mrf.mxu1  ;;  %2790 = vmatmul.mubr.bf16.gmra.mxu1 %v1177_v52 }
 0x26f   : > { %v3992_v51 = vpop.f32.mrf.mxu1 }
 0x270   : > { %v1179_v25 = vpack.c.bf16 %v3992_v51, %v3988_v27 }
 0x271   : > { %v3994_v35 = vpop.f32.mrf.mxu1 }
 0x272   : > { %v1178_v37 = vpack.c.bf16 %v3994_v35, %v3990_v34 }
 0x273   : > { %v4000_v46 = vpop.f32.mrf.mxu1 }
 0x274   : > { %2793 = vmatprep.mubr.bf16.mxu1 %v1178_v37 }
 0x275   : > { %v4002_v38 = vpop.f32.mrf.mxu1  ;;  %2794 = vmatmul.mubr.bf16.gmra.mxu1 %v1179_v25 }
 0x277   : > { %v4004_v59 = vpop.f32.mrf.mxu1 }
 0x278   : > { %v1181_v40 = vpack.c.bf16 %v4004_v59, %v4000_v46 }
 0x279   : > { %v4006_v7 = vpop.f32.mrf.mxu1 }
 0x27a   : > { %v1180_v42 = vpack.c.bf16 %v4006_v7, %v4002_v38 }
 0x27b   : > { %v4012_v43 = vpop.f32.mrf.mxu1  ;;  %v2735_v30 = vpop.f32.mrf.mxu0 }
 0x27c   : > { %2797 = vmatprep.mubr.bf16.mxu1 %v1180_v42 }
 0x27d   : > { %v4014_v10 = vpop.f32.mrf.mxu1  ;;  %2798 = vmatmul.mubr.bf16.gmra.mxu1 %v1181_v40  ;;  %v1302_v16 = vpop.f32.mrf.mxu0 }
 0x27f   : > { %v4016_v45 = vpop.f32.mrf.mxu1  ;;  %v2736_v36 = vpop.f32.mrf.mxu0 }
 0x280   : > { %v1183_v41 = vpack.c.bf16 %v4016_v45, %v4012_v43 }
 0x281   : > { %v4018_v13 = vpop.f32.mrf.mxu1  ;;  %v1305_v44 = vpop.f32.mrf.mxu0 }
 0x282   : > { %v1182_v1 = vpack.c.bf16 %v4018_v13, %v4014_v10 }
 0x283   : > { %v4024_v47 = vpop.f32.mrf.mxu1  ;;  %v2739_v17 = vpop.f32.mrf.mxu0 }
 0x284   : > { %2801 = vmatprep.mubr.bf16.mxu1 %v1182_v1 }
 0x285   : > { %v4026_v53 = vpop.f32.mrf.mxu1  ;;  %2802 = vmatmul.mubr.bf16.gmra.mxu1 %v1183_v41  ;;  %v1318_v50 = vpop.f32.mrf.mxu0 }
 0x287   : > { %v4028_v57 = vpop.f32.mrf.mxu1  ;;  %v2740_v18 = vpop.f32.mrf.mxu0 }
 0x288   : > { %v1185_v0 = vpack.c.bf16 %v4028_v57, %v4024_v47 }
 0x289   : > { %v4030_v62 = vpop.f32.mrf.mxu1  ;;  %v1321_v32 = vpop.f32.mrf.mxu0 }
 0x28a   : > { %v1184_v33 = vpack.c.bf16 %v4030_v62, %v4026_v53 }
 0x28b   : > { %v4036_v5 = vpop.f32.mrf.mxu1  ;;  %v2743_v19 = vpop.f32.mrf.mxu0 }
 0x28c   : > { %2805 = vmatprep.mubr.bf16.mxu1 %v1184_v33 }
 0x28d   : > { %v4038_v56 = vpop.f32.mrf.mxu1  ;;  %2806 = vmatmul.mubr.bf16.gmra.mxu1 %v1185_v0  ;;  %v1334_v22 = vpop.f32.mrf.mxu0 }
 0x28f   : > { %v4040_v6 = vpop.f32.mrf.mxu1  ;;  %v2744_v23 = vpop.f32.mrf.mxu0 }
 0x290   : > { %v1187_v58 = vpack.c.bf16 %v4040_v6, %v4036_v5 }
 0x291   : > { %v4042_v11 = vpop.f32.mrf.mxu1  ;;  %v1337_v26 = vpop.f32.mrf.mxu0 }
 0x292   : > { %v1186_v12 = vpack.c.bf16 %v4042_v11, %v4038_v56 }
 0x293   : > { %v4048_v39 = vpop.f32.mrf.mxu0 }
 0x294   : > { %2809 = vmatprep.mubr.bf16.mxu1 %v1186_v12 }
 0x295   : > { %2810 = vmatmul.mubr.bf16.gmra.mxu1 %v1187_v58  ;;  %v4050_v28 = vpop.f32.mrf.mxu0 }
 0x297   : > { %v4052_v29 = vpop.f32.mrf.mxu0 }
 0x299   : > { %v4054_v31 = vpop.f32.mrf.mxu0 }
 0x29b   : > { %v4056_v15 = vpop.f32.mrf.mxu0 }
 0x29d   : > { %v4058_v1 = vpop.f32.mrf.mxu0 }
 0x31d   : > { %v2783_v60 = vpop.f32.mrf.mxu1 }
 0x31e   : > { %v1520_v61 = vadd.f32 %v2783_v60, %v2735_v30  ;;  %v4060_v60 = vpop.f32.mrf.mxu0 }
 0x31f   : > { %v1511_v14 = vpop.f32.mrf.mxu1 }
 0x320   : > { %v2454_v4 = vmul.f32 -1.442695, %v1520_v61  ;;  %v1512_v52 = vadd.f32 %v1511_v14, %v1302_v16 }
 0x321   : > { %v2784_v37 = vpop.f32.mrf.mxu1 }
 0x322   : > { %3077 = vpow2.f32 %v2454_v4  ;;  %v2452_v25 = vmul.f32 -1.442695, %v1512_v52  ;;  %v1523_v42 = vadd.f32 %v2784_v37, %v2736_v36  ;;  %v4062_v37 = vpop.f32.mrf.mxu0 }
 0x323   : > { %v1514_v40 = vpop.f32.mrf.mxu1 }
 0x324   : > { %3079 = vpow2.f32 %v2452_v25  ;;  %v2455_v41 = vmul.f32 -1.442695, %v1523_v42  ;;  %v1515_v33 = vadd.f32 %v1514_v40, %v1305_v44 }
 0x325   : > { %v2787_v0 = vpop.f32.mrf.mxu1 }
 0x326   : > { %3081 = vpow2.f32 %v2455_v41  ;;  %v2453_v12 = vmul.f32 -1.442695, %v1515_v33  ;;  %v1536_v58 = vadd.f32 %v2787_v0, %v2739_v17  ;;  %v4064_v0 = vpop.f32.mrf.mxu0 }
 0x327   : > { %v1527_v30 = vpop.f32.mrf.mxu1 }
 0x328   : > { %3083 = vpow2.f32 %v2453_v12  ;;  %v2458_v61 = vmul.f32 -1.442695, %v1536_v58  ;;  %v1528_v16 = vadd.f32 %v1527_v30, %v1318_v50 }
 0x329   : > { %v2788_v14 = vpop.f32.mrf.mxu1 }
 0x32a   : > { %3085 = vpow2.f32 %v2458_v61  ;;  %v2456_v4 = vmul.f32 -1.442695, %v1528_v16  ;;  %v1539_v36 = vadd.f32 %v2788_v14, %v2740_v18 }
 0x32b   : > { %v1530_v52 = vpop.f32.mrf.mxu1 }
 0x32c   : > { %3087 = vpow2.f32 %v2456_v4  ;;  %v2459_v25 = vmul.f32 -1.442695, %v1539_v36  ;;  %v1531_v44 = vadd.f32 %v1530_v52, %v1321_v32  ;;  %v4066_v36 = vpop.f32.mrf.mxu0 }
 0x32d   : > { %v2791_v42 = vpop.f32.mrf.mxu1 }
 0x32e   : > { %3089 = vpow2.f32 %v2459_v25  ;;  %v2457_v40 = vmul.f32 -1.442695, %v1531_v44  ;;  %v1552_v17 = vadd.f32 %v2791_v42, %v2743_v19 }
 0x32f   : > { %v3078_v41 = vpop.eup %3077  ;;  %v1543_v33 = vpop.f32.mrf.mxu1 }
 0x330   : > { %v1736_v12 = vadd.f32 1.0, %v3078_v41  ;;  %3091 = vpow2.f32 %v2457_v40  ;;  %v2462_v50 = vmul.f32 -1.442695, %v1552_v17  ;;  %v1544_v58 = vadd.f32 %v1543_v33, %v1334_v22  ;;  %v4069_v33 = vpop.f32.mrf.mxu0 }
 0x331   : > { %v3080_v30 = vpop.eup %3079  ;;  %v2792_v18 = vpop.f32.mrf.mxu1 }
 0x332   : > { %3093 = vrcp.f32 %v1736_v12  ;;  %v1734_v61 = vadd.f32 1.0, %v3080_v30  ;;  %v2460_v16 = vmul.f32 -1.442695, %v1544_v58  ;;  %v1555_v14 = vadd.f32 %v2792_v18, %v2744_v23 }
 0x333   : > { %v3082_v4 = vpop.eup %3081  ;;  %3095 = vpow2.f32 %v2462_v50  ;;  %v1546_v32 = vpop.f32.mrf.mxu1 }
 0x334   : > { %3097 = vrcp.f32 %v1734_v61  ;;  %v1737_v19 = vadd.f32 1.0, %v3082_v4  ;;  %v2463_v52 = vmul.f32 -1.442695, %v1555_v14  ;;  %v1547_v25 = vadd.f32 %v1546_v32, %v1337_v26  ;;  %v4073_v4 = vpop.f32.mrf.mxu0 }
 0x335   : > { %v3084_v44 = vpop.eup %3083  ;;  %3099 = vpow2.f32 %v2460_v16  ;;  %v2795_v42 = vpop.f32.mrf.mxu1 }
 0x336   : > { %3101 = vrcp.f32 %v1737_v19  ;;  %v1735_v22 = vadd.f32 1.0, %v3084_v44  ;;  %v2461_v40 = vmul.f32 -1.442695, %v1547_v25  ;;  %v1568_v17 = vadd.f32 %v2795_v42, %v4048_v39 }
 0x337   : > { %v3086_v41 = vpop.eup %3085  ;;  %3103 = vpow2.f32 %v2463_v52  ;;  %v1559_v23 = vpop.f32.mrf.mxu1 }
 0x338   : > { %3105 = vrcp.f32 %v1735_v22  ;;  %v1740_v12 = vadd.f32 1.0, %v3086_v41  ;;  %v2466_v50 = vmul.f32 -1.442695, %v1568_v17  ;;  %v1560_v58 = vadd.f32 %v1559_v23, %v4050_v28  ;;  %v3205_v28 = vld [vmem:[#allocation2 + $0xd8] sm:$0xff]  ;;  %v3206_v41 = vld [vmem:[#allocation2 + $0xb0] sm:$0xff] }
 0x339   : > { %v3088_v30 = vpop.eup %3087  ;;  %3107 = vpow2.f32 %v2461_v40  ;;  %v2796_v26 = vpop.f32.mrf.mxu1  ;;  %v1832_v44 = vsub.f32 %v3952_v48, %v3205_v28  ;;  %v1830_v23 = vsub.f32 %v3954_v49, %v3206_v41 }
 0x33a   : > { %3109 = vrcp.f32 %v1740_v12  ;;  %v1738_v18 = vadd.f32 1.0, %v3088_v30  ;;  %v2464_v61 = vmul.f32 -1.442695, %v1560_v58  ;;  %v1571_v16 = vadd.f32 %v2796_v26, %v4052_v29 }
 0x33b   : > { %v3090_v14 = vpop.eup %3089  ;;  %3111 = vpow2.f32 %v2466_v50  ;;  %v1562_v39 = vpop.f32.mrf.mxu1 }
 0x33c   : > { %3113 = vrcp.f32 %v1738_v18  ;;  %v1741_v32 = vadd.f32 1.0, %v3090_v14  ;;  %v2467_v19 = vmul.f32 -1.442695, %v1571_v16  ;;  %v1563_v52 = vadd.f32 %v1562_v39, %v4054_v31  ;;  %v4079_v50 = vpop.f32.mrf.mxu0  ;;  %v3207_v18 = vld [vmem:[#allocation2 + $0x18] sm:$0xff] }
 0x33d   : > { %v3092_v25 = vpop.eup %3091  ;;  %3115 = vpow2.f32 %v2464_v61  ;;  %v2799_v42 = vpop.f32.mrf.mxu1  ;;  %v1833_v61 = vsub.f32 %v3956_v54, %v3207_v18 }
 0x33e   : > { %3117 = vrcp.f32 %v1741_v32  ;;  %v1739_v22 = vadd.f32 1.0, %v3092_v25  ;;  %v2465_v40 = vmul.f32 -1.442695, %v1563_v52  ;;  %v1584_v29 = vadd.f32 %v2799_v42, %v4056_v15  ;;  %v3208_v52 = vld [vmem:[#allocation2] sm:$0xff] }
 0x33f   : > { %v3094_v17 = vpop.eup %3093  ;;  %3119 = vpow2.f32 %v2467_v19  ;;  %v1575_v12 = vpop.f32.mrf.mxu1  ;;  %v1831_v25 = vsub.f32 %v3958_v55, %v3208_v52 }
 0x340   : > { %v3096_v31 = vpop.eup %3095  ;;  %v1864_v58 = vmul.f32 %v3094_v17, %v1832_v44  ;;  %3121 = vrcp.f32 %v1739_v22  ;;  %v2470_v30 = vmul.f32 -1.442695, %v1584_v29  ;;  %v1576_v48 = vadd.f32 %v1575_v12, %v4058_v1  ;;  %v4087_v22 = vpop.f32.mrf.mxu0 }
 0x341   : > { %v3098_v26 = vpop.eup %3097  ;;  %v1744_v16 = vadd.f32 1.0, %v3096_v31  ;;  %3123 = vpow2.f32 %v2465_v40  ;;  %v2800_v15 = vpop.f32.mrf.mxu1 }
 0x342   : > { %v3100_v14 = vpop.eup %3099  ;;  %v4083_v39 = vadd.f32 %v3205_v28, %v1864_v58  ;;  %v1862_v49 = vmul.f32 %v3098_v26, %v1830_v23  ;;  %3125 = vpow2.f32 %v2470_v30  ;;  %v2468_v32 = vmul.f32 -1.442695, %v1576_v48  ;;  %v3209_v23 = vld [vmem:[#allocation2 + $0x30] sm:$0xff] }
 0x343   : > { %v3102_v19 = vpop.eup %3101  ;;  %3127 = vrcp.f32 %v1744_v16  ;;  %v1742_v44 = vadd.f32 1.0, %v3100_v14  ;;  %v1587_v1 = vadd.f32 %v2800_v15, %v4060_v60  ;;  %v1578_v42 = vpop.f32.mrf.mxu1  ;;  %v1836_v55 = vsub.f32 %v3964_v2, %v3209_v23  ;;  %v3210_v16 = vld [vmem:[#allocation2 + $0x50] sm:$0xff] }
 0x344   : > { %v3104_v54 = vpop.eup %3103  ;;  %1928 = vst [vmem:[#allocation2 + $0xd8] sm:$0xff] %v4083_v39  ;;  %v4090_v40 = vadd.f32 %v3206_v41, %v1862_v49  ;;  %v1865_v28 = vmul.f32 %v3102_v19, %v1833_v61  ;;  %3129 = vpow2.f32 %v2468_v32  ;;  %v1579_v29 = vadd.f32 %v1578_v42, %v4062_v37  ;;  %v4099_v14 = vpop.f32.mrf.mxu0 }
 0x345   : > { %v3106_v17 = vpop.eup %3105  ;;  %3131 = vrcp.f32 %v1742_v44  ;;  %v1745_v12 = vadd.f32 1.0, %v3104_v54  ;;  %v2471_v31 = vmul.f32 -1.442695, %v1587_v1  ;;  %v2803_v60 = vpop.f32.mrf.mxu1  ;;  %v1834_v37 = vsub.f32 %v3966_v3, %v3210_v16  ;;  %v3211_v44 = vld [vmem:[#allocation2 + $0x48] sm:$0xff] }
 0x346   : > { %v3108_v58 = vpop.eup %3107  ;;  %1926 = vst [vmem:[#allocation2 + $0xb0] sm:$0xff] %v4090_v40  ;;  %v4095_v30 = vadd.f32 %v3207_v18, %v1865_v28  ;;  %v1863_v48 = vmul.f32 %v3106_v17, %v1831_v25  ;;  %v2469_v41 = vmul.f32 -1.442695, %v1579_v29  ;;  %v1600_v26 = vadd.f32 %v2803_v60, %v4064_v0 }
 0x347   : > { %v3110_v61 = vpop.eup %3109  ;;  %3133 = vrcp.f32 %v1745_v12  ;;  %v1743_v15 = vadd.f32 1.0, %v3108_v58  ;;  %v1591_v2 = vpop.f32.mrf.mxu1  ;;  %v1837_v0 = vsub.f32 %v3968_v8, %v3211_v44 }
 0x348   : > { %v3112_v49 = vpop.eup %3111  ;;  %1929 = vst [vmem:[#allocation2 + $0x18] sm:$0xff] %v4095_v30  ;;  %v4102_v32 = vadd.f32 %v3208_v52, %v1863_v48  ;;  %v1868_v18 = vmul.f32 %v3110_v61, %v1836_v55  ;;  %3135 = vpow2.f32 %v2471_v31  ;;  %v2474_v19 = vmul.f32 -1.442695, %v1600_v26  ;;  %v3212_v55 = vld [vmem:[#allocation2 + $0x68] sm:$0xff]  ;;  %v1401_v58 = vpop.f32.mrf.mxu0 }
 0x349   : > { %v3114_v25 = vpop.eup %3113  ;;  %3137 = vrcp.f32 %v1743_v15  ;;  %v1748_v1 = vadd.f32 1.0, %v3112_v49  ;;  %v1592_v3 = vadd.f32 %v1591_v2, %v4066_v36  ;;  %v2804_v42 = vpop.f32.mrf.mxu1  ;;  %v1835_v12 = vsub.f32 %v3970_v9, %v3212_v55 }
 0x34a   : > { %v3116_v54 = vpop.eup %3115  ;;  %1927 = vst [vmem:[#allocation2] sm:$0xff] %v4102_v32  ;;  %v4107_v28 = vadd.f32 %v3209_v23, %v1868_v18  ;;  %v1866_v29 = vmul.f32 %v3114_v25, %v1834_v37  ;;  %3139 = vpow2.f32 %v2469_v41  ;;  %v1603_v52 = vadd.f32 %v2804_v42, %v4069_v33  ;;  %v3213_v18 = vld [vmem:[#allocation2 + $0xe8] sm:$0xff]  ;;  %v3214_v42 = vld [vmem:[#allocation2 + $0x80] sm:$0xff] }
 0x34b   : > { %v3118_v17 = vpop.eup %3117  ;;  %3141 = vrcp.f32 %v1748_v1  ;;  %v1746_v8 = vadd.f32 1.0, %v3116_v54  ;;  %v2472_v31 = vmul.f32 -1.442695, %v1592_v3  ;;  %v1594_v60 = vpop.f32.mrf.mxu1  ;;  %v1838_v54 = vsub.f32 %v3978_v21, %v3214_v42 }
 0x34c   : > { %v3120_v36 = vpop.eup %3119  ;;  %1932 = vst [vmem:[#allocation2 + $0x30] sm:$0xff] %v4107_v28  ;;  %v4112_v48 = vadd.f32 %v3210_v16, %v1866_v29  ;;  %v1869_v23 = vmul.f32 %v3118_v17, %v1837_v0  ;;  %3143 = vpow2.f32 %v2474_v19  ;;  %v2475_v26 = vmul.f32 -1.442695, %v1603_v52  ;;  %v2763_v1 = vpop.f32.mrf.mxu0 }
 0x34d   : > { %v3122_v41 = vpop.eup %3121  ;;  %3145 = vrcp.f32 %v1746_v8  ;;  %v1749_v33 = vadd.f32 1.0, %v3120_v36  ;;  %v1595_v61 = vadd.f32 %v1594_v60, %v4073_v4  ;;  %v2807_v37 = vpop.f32.mrf.mxu1  ;;  %v1840_v19 = vsub.f32 %v3976_v20, %v3213_v18 }
 0x34e   : > { %v3124_v9 = vpop.eup %3123  ;;  %1930 = vst [vmem:[#allocation2 + $0x50] sm:$0xff] %v4112_v48  ;;  %v4116_v15 = vadd.f32 %v3211_v44, %v1869_v23  ;;  %v1867_v2 = vmul.f32 %v3122_v41, %v1835_v12  ;;  %3147 = vpow2.f32 %v2472_v31  ;;  %v1616_v49 = vadd.f32 %v2807_v37, %v4079_v50  ;;  %v3215_v31 = vld [vmem:[#allocation2 + $0xb8] sm:$0xff]  ;;  %v1414_v41 = vpop.f32.mrf.mxu0 }
 0x34f   : > { %v3126_v16 = vpop.eup %3125  ;;  %3149 = vrcp.f32 %v1749_v33  ;;  %v1747_v25 = vadd.f32 1.0, %v3124_v9  ;;  %v2473_v0 = vmul.f32 -1.442695, %v1595_v61  ;;  %v1607_v3 = vpop.f32.mrf.mxu1  ;;  %v1841_v60 = vsub.f32 %v3980_v24, %v3215_v31 }
 0x350   : > { %v3128_v4 = vpop.eup %3127  ;;  %1933 = vst [vmem:[#allocation2 + $0x48] sm:$0xff] %v4116_v15  ;;  %v4122_v44 = vadd.f32 %v3212_v55, %v1867_v2  ;;  %v1752_v29 = vadd.f32 1.0, %v3126_v16  ;;  %3151 = vpow2.f32 %v2475_v26  ;;  %v2478_v17 = vmul.f32 -1.442695, %v1616_v49  ;;  %v3216_v2 = vld [vmem:[#allocation2 + $0x88] sm:$0xff] }
 0x351   : > { %v3130_v50 = vpop.eup %3129  ;;  %v1872_v52 = vmul.f32 %v3128_v4, %v1840_v19  ;;  %3153 = vrcp.f32 %v1747_v25  ;;  %v1608_v20 = vadd.f32 %v1607_v3, %v4087_v22  ;;  %v2808_v12 = vpop.f32.mrf.mxu1  ;;  %v1839_v24 = vsub.f32 %v3982_v63, %v3216_v2  ;;  %v3217_v4 = vld [vmem:[#allocation2 + $0x8] sm:$0xff] }
 0x352   : > { %v3132_v8 = vpop.eup %3131  ;;  %1931 = vst [vmem:[#allocation2 + $0x68] sm:$0xff] %v4122_v44  ;;  %3155 = vrcp.f32 %v1752_v29  ;;  %v1750_v21 = vadd.f32 1.0, %v3130_v50  ;;  %v1619_v55 = vadd.f32 %v2808_v12, %v4099_v14 }
 0x353   : > { %v4128_v36 = vadd.f32 %v3213_v18, %v1872_v52  ;;  %v1870_v23 = vmul.f32 %v3132_v8, %v1838_v54  ;;  %3157 = vpow2.f32 %v2473_v0  ;;  %v2476_v26 = vmul.f32 -1.442695, %v1608_v20  ;;  %v1610_v33 = vpop.f32.mrf.mxu1  ;;  %v3218_v8 = vld [vmem:[#allocation2 + $0x60] sm:$0xff] }
 0x354   : > { %v3134_v61 = vpop.eup %3133  ;;  %3159 = vrcp.f32 %v1750_v21  ;;  %v2479_v22 = vmul.f32 -1.442695, %v1619_v55  ;;  %v1611_v37 = vadd.f32 %v1610_v33, %v1401_v58  ;;  %v1844_v58 = vsub.f32 %v3988_v27, %v3217_v4 }
 0x355   : > { %v3136_v9 = vpop.eup %3135  ;;  %1936 = vst [vmem:[#allocation2 + $0xe8] sm:$0xff] %v4128_v36  ;;  %v4132_v49 = vadd.f32 %v3214_v42, %v1870_v23  ;;  %v1873_v14 = vmul.f32 %v3134_v61, %v1841_v60  ;;  %3161 = vpow2.f32 %v2478_v17  ;;  %v2811_v16 = vpop.f32.mrf.mxu1  ;;  %v3219_v61 = vld [vmem:[#allocation2 + $0x78] sm:$0xff] }
 0x356   : > { %v3138_v18 = vpop.eup %3137  ;;  %v1753_v19 = vadd.f32 1.0, %v3136_v9  ;;  %3163 = vpow2.f32 %v2476_v26  ;;  %v2477_v25 = vmul.f32 -1.442695, %v1611_v37  ;;  %v1632_v0 = vadd.f32 %v2811_v16, %v2763_v1  ;;  %v2764_v42 = vpop.f32.mrf.mxu0 }
 0x357   : > { %v3140_v3 = vpop.eup %3139  ;;  %1934 = vst [vmem:[#allocation2 + $0x80] sm:$0xff] %v4132_v49  ;;  %v4136_v54 = vadd.f32 %v3215_v31, %v1873_v14  ;;  %v1871_v63 = vmul.f32 %v3138_v18, %v1839_v24  ;;  %3165 = vpow2.f32 %v2479_v22  ;;  %v1623_v29 = vpop.f32.mrf.mxu1  ;;  %v1842_v1 = vsub.f32 %v3990_v34, %v3218_v8 }
 0x358   : > { %v3142_v50 = vpop.eup %3141  ;;  %3167 = vrcp.f32 %v1753_v19  ;;  %v1751_v52 = vadd.f32 1.0, %v3140_v3  ;;  %v2482_v17 = vmul.f32 -1.442695, %v1632_v0  ;;  %v1624_v20 = vadd.f32 %v1623_v29, %v1414_v41  ;;  %v1417_v37 = vpop.f32.mrf.mxu0  ;;  %v3220_v19 = vld [vmem:[#allocation2 + $0xf0] sm:$0xff] }
 0x359   : > { %v3144_v12 = vpop.eup %3143  ;;  %1937 = vst [vmem:[#allocation2 + $0xb8] sm:$0xff] %v4136_v54  ;;  %v4140_v27 = vadd.f32 %v3216_v2, %v1871_v63  ;;  %v1876_v60 = vmul.f32 %v3142_v50, %v1844_v58  ;;  %3169 = vpow2.f32 %v2477_v25  ;;  %v2812_v31 = vpop.f32.mrf.mxu1  ;;  %v1845_v41 = vsub.f32 %v3992_v51, %v3219_v61 }
 0x35a   : > { %v3146_v21 = vpop.eup %3145  ;;  %3171 = vrcp.f32 %v1751_v52  ;;  %v1756_v55 = vadd.f32 1.0, %v3144_v12  ;;  %v2480_v23 = vmul.f32 -1.442695, %v1624_v20  ;;  %v1635_v26 = vadd.f32 %v2812_v31, %v2764_v42 }
 0x35b   : > { %v3148_v33 = vpop.eup %3147  ;;  %1935 = vst [vmem:[#allocation2 + $0x88] sm:$0xff] %v4140_v27  ;;  %v4144_v22 = vadd.f32 %v3217_v4, %v1876_v60  ;;  %v1874_v34 = vmul.f32 %v3146_v21, %v1842_v1  ;;  %3173 = vpow2.f32 %v2482_v17  ;;  %v1626_v9 = vpop.f32.mrf.mxu1  ;;  %v1843_v25 = vsub.f32 %v3994_v35, %v3220_v19  ;;  %v3221_v4 = vld [vmem:[#allocation2 + $0x40] sm:$0xff]  ;;  %v3222_v17 = vld [vmem:[#allocation2 + $0x38] sm:$0xff] }
 0x35c   : > { %v3150_v2 = vpop.eup %3149  ;;  %3175 = vrcp.f32 %v1756_v55  ;;  %v1754_v24 = vadd.f32 1.0, %v3148_v33  ;;  %v2483_v14 = vmul.f32 -1.442695, %v1635_v26  ;;  %v1627_v16 = vadd.f32 %v1626_v9, %v1417_v37 }
 0x35d   : > { %v3152_v18 = vpop.eup %3151  ;;  %1940 = vst [vmem:[#allocation2 + $0x8] sm:$0xff] %v4144_v22  ;;  %v4148_v51 = vadd.f32 %v3218_v8, %v1874_v34  ;;  %v1877_v0 = vmul.f32 %v3150_v2, %v1845_v41  ;;  %3177 = vpow2.f32 %v2480_v23  ;;  %v1848_v58 = vsub.f32 %v4000_v46, %v3221_v4  ;;  %v3224_v2 = vld [vmem:[#allocation2 + $0x58] sm:$0xff] }
 0x35e   : > { %v3154_v3 = vpop.eup %3153  ;;  %3179 = vrcp.f32 %v1754_v24  ;;  %v1757_v63 = vadd.f32 1.0, %v3152_v18  ;;  %v2481_v42 = vmul.f32 -1.442695, %v1627_v16  ;;  %v1846_v20 = vsub.f32 %v4002_v38, %v3222_v17  ;;  %v3223_v38 = vld [vmem:[#allocation2 + $0xc8] sm:$0xff] }
 0x35f   : > { %v3156_v29 = vpop.eup %3155  ;;  %1938 = vst [vmem:[#allocation2 + $0x60] sm:$0xff] %v4148_v51  ;;  %v4152_v50 = vadd.f32 %v3219_v61, %v1877_v0  ;;  %v1875_v52 = vmul.f32 %v3154_v3, %v1843_v25  ;;  %3181 = vpow2.f32 %v2483_v14  ;;  %v1849_v33 = vsub.f32 %v4004_v59, %v3223_v38 }
 0x360   : > { %v3158_v35 = vpop.eup %3157  ;;  %v1880_v12 = vmul.f32 %v3156_v29, %v1848_v58  ;;  %3183 = vrcp.f32 %v1757_v63  ;;  %v1847_v24 = vsub.f32 %v4006_v7, %v3224_v2 }
 0x361   : > { %v3160_v8 = vpop.eup %3159  ;;  %1941 = vst [vmem:[#allocation2 + $0x78] sm:$0xff] %v4152_v50  ;;  %v4156_v46 = vadd.f32 %v3220_v19, %v1875_v52  ;;  %v1755_v1 = vadd.f32 1.0, %v3158_v35  ;;  %3185 = vpow2.f32 %v2481_v42  ;;  %v3225_v19 = vld [vmem:[#allocation2 + $0x70] sm:$0xff]  ;;  %v3226_v42 = vld [vmem:[#allocation2 + $0xe0] sm:$0xff] }
 0x362   : > { %v3162_v60 = vpop.eup %3161  ;;  %v4158_v31 = vadd.f32 %v3221_v4, %v1880_v12  ;;  %v1878_v21 = vmul.f32 %v3160_v8, %v1846_v20  ;;  %v1852_v25 = vsub.f32 %v4012_v43, %v3225_v19  ;;  %v1850_v7 = vsub.f32 %v4014_v10, %v3226_v42  ;;  %v3227_v43 = vld [vmem:[#allocation2 + $0xc0] sm:$0xff] }
 0x363   : > { %v3164_v55 = vpop.eup %3163  ;;  %1939 = vst [vmem:[#allocation2 + $0xf0] sm:$0xff] %v4156_v46  ;;  %3187 = vrcp.f32 %v1755_v1  ;;  %v1760_v23 = vadd.f32 1.0, %v3162_v60  ;;  %v1853_v12 = vsub.f32 %v4016_v45, %v3227_v43 }
 0x364   : > { %v3166_v26 = vpop.eup %3165  ;;  %1944 = vst [vmem:[#allocation2 + $0x40] sm:$0xff] %v4158_v31  ;;  %v4163_v61 = vadd.f32 %v3222_v17, %v1878_v21  ;;  %v1758_v41 = vadd.f32 1.0, %v3164_v55 }
 0x365   : > { %v3168_v34 = vpop.eup %3167  ;;  %3189 = vrcp.f32 %v1760_v23  ;;  %v1761_v37 = vadd.f32 1.0, %v3166_v26  ;;  %v3228_v26 = vld [vmem:[#allocation2 + $0x90] sm:$0xff] }
 0x366   : > { %v3170_v9 = vpop.eup %3169  ;;  %1942 = vst [vmem:[#allocation2 + $0x38] sm:$0xff] %v4163_v61  ;;  %v1881_v14 = vmul.f32 %v3168_v34, %v1849_v33  ;;  %3191 = vrcp.f32 %v1758_v41  ;;  %v3229_v34 = vld [vmem:[#allocation2 + $0x10] sm:$0xff] }
 0x367   : > { %v3172_v16 = vpop.eup %3171  ;;  %3193 = vrcp.f32 %v1761_v37  ;;  %v1759_v18 = vadd.f32 1.0, %v3170_v9  ;;  %v1856_v37 = vsub.f32 %v4024_v47, %v3229_v34 }
 0x368   : > { %v3174_v59 = vpop.eup %3173  ;;  %v4168_v0 = vadd.f32 %v3223_v38, %v1881_v14  ;;  %v1879_v3 = vmul.f32 %v3172_v16, %v1847_v24  ;;  %v1851_v38 = vsub.f32 %v4018_v13, %v3228_v26  ;;  %v3230_v24 = vld [vmem:[#allocation2 + $0xa8] sm:$0xff] }
 0x369   : > { %v3176_v4 = vpop.eup %3175  ;;  %3195 = vrcp.f32 %v1759_v18  ;;  %v1764_v58 = vadd.f32 1.0, %v3174_v59  ;;  %v1854_v14 = vsub.f32 %v4026_v53, %v3230_v24  ;;  %v3231_v13 = vld [vmem:[#allocation2 + $0x28] sm:$0xff] }
 0x36a   : > { %v3178_v63 = vpop.eup %3177  ;;  %1945 = vst [vmem:[#allocation2 + $0xc8] sm:$0xff] %v4168_v0  ;;  %v4172_v29 = vadd.f32 %v3224_v2, %v1879_v3  ;;  %v1884_v52 = vmul.f32 %v3176_v4, %v1852_v25  ;;  %v1857_v18 = vsub.f32 %v4028_v57, %v3231_v13  ;;  %v3232_v4 = vld [vmem:[#allocation2 + $0xd0] sm:$0xff] }
 0x36b   : > { %v3180_v35 = vpop.eup %3179  ;;  %3197 = vrcp.f32 %v1764_v58  ;;  %v1762_v17 = vadd.f32 1.0, %v3178_v63  ;;  %v1855_v47 = vsub.f32 %v4030_v62, %v3232_v4  ;;  %v3234_v62 = vld [vmem:[#allocation2 + $0xa0] sm:$0xff] }
 0x36c   : > { %v3182_v20 = vpop.eup %3181  ;;  %1943 = vst [vmem:[#allocation2 + $0x58] sm:$0xff] %v4172_v29  ;;  %v4176_v8 = vadd.f32 %v3225_v19, %v1884_v52  ;;  %v1882_v1 = vmul.f32 %v3180_v35, %v1850_v7  ;;  %v3233_v7 = vld [vmem:[#allocation2 + $0x20] sm:$0xff] }
 0x36d   : > { %v3184_v60 = vpop.eup %3183  ;;  %3199 = vrcp.f32 %v1762_v17  ;;  %v1765_v10 = vadd.f32 1.0, %v3182_v20  ;;  %v1860_v52 = vsub.f32 %v4036_v5, %v3233_v7  ;;  %v1858_v20 = vsub.f32 %v4038_v56, %v3234_v62 }
 0x36e   : > { %v3186_v21 = vpop.eup %3185  ;;  %1948 = vst [vmem:[#allocation2 + $0x70] sm:$0xff] %v4176_v8  ;;  %v4179_v55 = vadd.f32 %v3226_v42, %v1882_v1  ;;  %v1885_v23 = vmul.f32 %v3184_v60, %v1853_v12  ;;  %v3235_v60 = vld [vmem:[#allocation2 + $0x98] sm:$0xff] }
 0x36f   : > { %3201 = vrcp.f32 %v1765_v10  ;;  %v1763_v33 = vadd.f32 1.0, %v3186_v21  ;;  %v1861_v5 = vsub.f32 %v4040_v6, %v3235_v60 }
 0x370   : > { %v3188_v45 = vpop.eup %3187  ;;  %1946 = vst [vmem:[#allocation2 + $0xe0] sm:$0xff] %v4179_v55  ;;  %v4183_v41 = vadd.f32 %v3227_v43, %v1885_v23 }
 0x371   : > { %v1883_v9 = vmul.f32 %v3188_v45, %v1851_v38  ;;  %3203 = vrcp.f32 %v1763_v33 }
 0x372   : > { %v3190_v2 = vpop.eup %3189  ;;  %1949 = vst [vmem:[#allocation2 + $0xc0] sm:$0xff] %v4183_v41 }
 0x373   : > { %v3192_v16 = vpop.eup %3191  ;;  %v4189_v59 = vadd.f32 %v3228_v26, %v1883_v9  ;;  %v1888_v19 = vmul.f32 %v3190_v2, %v1856_v37  ;;  %v3236_v26 = vld [vmem:[#allocation2 + $0xf8] sm:$0xff] }
 0x374   : > { %v3194_v25 = vpop.eup %3193  ;;  %v1886_v3 = vmul.f32 %v3192_v16, %v1854_v14  ;;  %v1859_v38 = vsub.f32 %v4042_v11, %v3236_v26 }
 0x375   : > { %1947 = vst [vmem:[#allocation2 + $0x90] sm:$0xff] %v4189_v59  ;;  %v4193_v58 = vadd.f32 %v3229_v34, %v1888_v19  ;;  %v1889_v63 = vmul.f32 %v3194_v25, %v1857_v18 }
 0x376   : > { %v3196_v53 = vpop.eup %3195  ;;  %v4195_v42 = vadd.f32 %v3230_v24, %v1886_v3 }
 0x377   : > { %1952 = vst [vmem:[#allocation2 + $0x10] sm:$0xff] %v4193_v58  ;;  %v4199_v57 = vadd.f32 %v3231_v13, %v1889_v63  ;;  %v1887_v35 = vmul.f32 %v3196_v53, %v1855_v47 }
 0x378   : > { %v3198_v17 = vpop.eup %3197  ;;  %1950 = vst [vmem:[#allocation2 + $0xa8] sm:$0xff] %v4195_v42 }
 0x379   : > { %1953 = vst [vmem:[#allocation2 + $0x28] sm:$0xff] %v4199_v57  ;;  %v4204_v43 = vadd.f32 %v3232_v4, %v1887_v35  ;;  %v1892_v12 = vmul.f32 %v3198_v17, %v1860_v52 }
 0x37a   : > { %v3200_v1 = vpop.eup %3199 }
 0x37b   : > { %1951 = vst [vmem:[#allocation2 + $0xd0] sm:$0xff] %v4204_v43  ;;  %v4208_v10 = vadd.f32 %v3233_v7, %v1892_v12  ;;  %v1890_v21 = vmul.f32 %v3200_v1, %v1858_v20 }
 0x37c   : > { %v3202_v23 = vpop.eup %3201 }
 0x37d   : > { %1956 = vst [vmem:[#allocation2 + $0x20] sm:$0xff] %v4208_v10  ;;  %v4212_v56 = vadd.f32 %v3234_v62, %v1890_v21  ;;  %v1893_v33 = vmul.f32 %v3202_v23, %v1861_v5 }
 0x37e   : > { %v3204_v45 = vpop.eup %3203 }
 0x37f   : > { %1954 = vst [vmem:[#allocation2 + $0xa0] sm:$0xff] %v4212_v56  ;;  %v4215_v34 = vadd.f32 %v3235_v60, %v1893_v33  ;;  %v1891_v6 = vmul.f32 %v3204_v45, %v1859_v38  ;;  %1961 = sbr.rel (%p2484_p7) target bundleno = 1157 (0x485), region = 76 }
 0x381   : > { %1957 = vst [vmem:[#allocation2 + $0x98] sm:$0xff] %v4215_v34  ;;  %v4218_v37 = vadd.f32 %v3236_v26, %v1891_v6 }
 0x383   : > { %1955 = vst [vmem:[#allocation2 + $0xf8] sm:$0xff] %v4218_v37 }
 0x384   : > { %v3237_v11 = vld [vmem:[#allocation12 + $0x38] sm:$0xff]   ;;  %v3238_v9 = vld [vmem:[#allocation12 + $0x30] sm:$0xff]   ;;  %v1962_v2 = vpack.c.bf16 %v4102_v32, %v4090_v40  ;;  %v1970_v24 = vpack.c.bf16 %v4172_v29, %v4163_v61  ;;  %v3239_v14 = vld [vmem:[#allocation12 + $0x28] sm:$0xff]   ;;  %v1963_v13 = vpack.c.bf16 %v4095_v30, %v4083_v39  ;;  %v1971_v18 = vpack.c.bf16 %v4168_v0, %v4158_v31 }
 0x385   : > { %2813 = vmatprep.subr.bf16.mxu0 %v3237_v11  ;;  %2861 = vmatprep.subr.bf16.mxu1 %v3237_v11  ;;  %v3240_v16 = vld [vmem:[#allocation12 + $0x20] sm:$0xff]   ;;  %v3241_v40 = vld [vmem:[#allocation12 + $0x18] sm:$0xff]   ;;  %v3242_v32 = vld [vmem:[#allocation12 + $0x10] sm:$0xff]   ;;  %v1964_v19 = vpack.c.bf16 %v4122_v44, %v4112_v48  ;;  %v1972_v25 = vpack.c.bf16 %v4189_v59, %v4179_v55  ;;  %v1965_v3 = vpack.c.bf16 %v4116_v15, %v4107_v28 }
 0x386   : > { %2814 = vmatpush3.bf16.msra.mxu0 %v3237_v11  ;;  %2869 = vmatpush3.bf16.msra.mxu1 %v3237_v11  ;;  %v3243_v61 = vld [vmem:[#allocation12 + $0x8] sm:$0xff]   ;;  %v3244_v29 = vld [vmem:[#allocation12] sm:$0xff]   ;;  %v1973_v39 = vpack.c.bf16 %v4183_v41, %v4176_v8  ;;  %v1966_v30 = vpack.c.bf16 %v4140_v27, %v4132_v49  ;;  %v1974_v31 = vpack.c.bf16 %v4204_v43, %v4195_v42 }
 0x387   : > { %2815 = vmatprep.subr.bf16.mxu0 %v3238_v9  ;;  %2862 = vmatprep.subr.bf16.mxu1 %v3238_v9  ;;  %v1967_v48 = vpack.c.bf16 %v4136_v54, %v4128_v36  ;;  %v1975_v44 = vpack.c.bf16 %v4199_v57, %v4193_v58  ;;  %v1968_v28 = vpack.c.bf16 %v4156_v46, %v4148_v51 }
 0x388   : > { %2829 = vmatprep.mubr.bf16.mxu0 %v1962_v2  ;;  %2845 = vmatprep.mubr.bf16.mxu1 %v1970_v24  ;;  %v1976_v15 = vpack.c.bf16 %v4218_v37, %v4212_v56  ;;  %v1969_v49 = vpack.c.bf16 %v4152_v50, %v4144_v22  ;;  %v1977_v27 = vpack.c.bf16 %v4215_v34, %v4208_v10 }
 0x38a   : > { %2816 = vmatpush3.bf16.msra.mxu0 %v3238_v9  ;;  %2870 = vmatpush3.bf16.msra.mxu1 %v3238_v9 }
 0x38b   : > { %2817 = vmatprep.subr.bf16.mxu0 %v3239_v14  ;;  %2863 = vmatprep.subr.bf16.mxu1 %v3239_v14 }
 0x38e   : > { %2818 = vmatpush3.bf16.msra.mxu0 %v3239_v14  ;;  %2871 = vmatpush3.bf16.msra.mxu1 %v3239_v14 }
 0x38f   : > { %2819 = vmatprep.subr.bf16.mxu0 %v3240_v16  ;;  %2864 = vmatprep.subr.bf16.mxu1 %v3240_v16 }
 0x392   : > { %2820 = vmatpush3.bf16.msra.mxu0 %v3240_v16  ;;  %2872 = vmatpush3.bf16.msra.mxu1 %v3240_v16 }
 0x393   : > { %2821 = vmatprep.subr.bf16.mxu0 %v3241_v40  ;;  %2865 = vmatprep.subr.bf16.mxu1 %v3241_v40 }
 0x396   : > { %2822 = vmatpush3.bf16.msra.mxu0 %v3241_v40  ;;  %2873 = vmatpush3.bf16.msra.mxu1 %v3241_v40 }
 0x397   : > { %2823 = vmatprep.subr.bf16.mxu0 %v3242_v32  ;;  %2866 = vmatprep.subr.bf16.mxu1 %v3242_v32 }
 0x39a   : > { %2824 = vmatpush3.bf16.msra.mxu0 %v3242_v32  ;;  %2874 = vmatpush3.bf16.msra.mxu1 %v3242_v32 }
 0x39b   : > { %2825 = vmatprep.subr.bf16.mxu0 %v3243_v61  ;;  %2867 = vmatprep.subr.bf16.mxu1 %v3243_v61 }
 0x39e   : > { %2826 = vmatpush3.bf16.msra.mxu0 %v3243_v61  ;;  %2875 = vmatpush3.bf16.msra.mxu1 %v3243_v61 }
 0x39f   : > { %2827 = vmatprep.subr.bf16.mxu0 %v3244_v29  ;;  %2868 = vmatprep.subr.bf16.mxu1 %v3244_v29 }
 0x3a2   : > { %2828 = vmatpush3.bf16.msra.mxu0 %v3244_v29  ;;  %2876 = vmatpush3.bf16.msra.mxu1 %v3244_v29 }
 0x3a5   : > { %2830 = vmatmul.mubr.bf16.vlgmr.msra.gmra.mxu0 %v1963_v13  ;;  %2846 = vmatmul.mubr.bf16.vlgmr.msra.gmra.mxu1 %v1971_v18 }
 0x3a6   : > { %2833 = vmatprep.mubr.bf16.mxu0 %v1964_v19  ;;  %2849 = vmatprep.mubr.bf16.mxu1 %v1972_v25 }
 0x3ad   : > { %2834 = vmatmul.mubr.bf16.gmra.mxu0 %v1965_v3  ;;  %2850 = vmatmul.mubr.bf16.gmra.mxu1 %v1973_v39 }
 0x3ae   : > { %2837 = vmatprep.mubr.bf16.mxu0 %v1966_v30  ;;  %2853 = vmatprep.mubr.bf16.mxu1 %v1974_v31 }
 0x3b5   : > { %2838 = vmatmul.mubr.bf16.gmra.mxu0 %v1967_v48  ;;  %2854 = vmatmul.mubr.bf16.gmra.mxu1 %v1975_v44 }
 0x3b6   : > { %2841 = vmatprep.mubr.bf16.mxu0 %v1968_v28  ;;  %2857 = vmatprep.mubr.bf16.mxu1 %v1976_v15 }
 0x3bd   : > { %2842 = vmatmul.mubr.bf16.gmra.mxu0 %v1969_v49  ;;  %2858 = vmatmul.mubr.bf16.gmra.mxu1 %v1977_v27 }
 0x465   : > { %v2831_v36 = vpop.f32.mrf.mxu0  ;;  %v2847_v54 = vpop.f32.mrf.mxu1 }
 0x466   : > { %2205 = vst [vmem:[#allocation14 + $0x10] sm:$0xff] %v2831_v36  ;;  %2221 = vst [vmem:[#allocation14 + $0x90] sm:$0xff] %v2847_v54 }
 0x467   : > { %v2076_v51 = vpop.f32.mrf.mxu0  ;;  %v2140_v46 = vpop.f32.mrf.mxu1 }
 0x468   : > { %2203 = vst [vmem:[#allocation14] sm:$0xff] %v2076_v51  ;;  %2219 = vst [vmem:[#allocation14 + $0x80] sm:$0xff] %v2140_v46 }
 0x469   : > { %v2832_v0 = vpop.f32.mrf.mxu0  ;;  %v2848_v8 = vpop.f32.mrf.mxu1 }
 0x46a   : > { %2206 = vst [vmem:[#allocation14 + $0x18] sm:$0xff] %v2832_v0  ;;  %2222 = vst [vmem:[#allocation14 + $0x98] sm:$0xff] %v2848_v8 }
 0x46b   : > { %v2079_v55 = vpop.f32.mrf.mxu0  ;;  %v2143_v41 = vpop.f32.mrf.mxu1 }
 0x46c   : > { %2204 = vst [vmem:[#allocation14 + $0x8] sm:$0xff] %v2079_v55  ;;  %2220 = vst [vmem:[#allocation14 + $0x88] sm:$0xff] %v2143_v41 }
 0x46d   : > { %v2835_v22 = vpop.f32.mrf.mxu0  ;;  %v2851_v50 = vpop.f32.mrf.mxu1 }
 0x46e   : > { %2209 = vst [vmem:[#allocation14 + $0x30] sm:$0xff] %v2835_v22  ;;  %2225 = vst [vmem:[#allocation14 + $0xb0] sm:$0xff] %v2851_v50 }
 0x46f   : > { %v2092_v59 = vpop.f32.mrf.mxu0  ;;  %v2156_v4 = vpop.f32.mrf.mxu1 }
 0x470   : > { %2207 = vst [vmem:[#allocation14 + $0x20] sm:$0xff] %v2092_v59  ;;  %2223 = vst [vmem:[#allocation14 + $0xa0] sm:$0xff] %v2156_v4 }
 0x471   : > { %v2836_v47 = vpop.f32.mrf.mxu0  ;;  %v2852_v58 = vpop.f32.mrf.mxu1 }
 0x472   : > { %2210 = vst [vmem:[#allocation14 + $0x38] sm:$0xff] %v2836_v47  ;;  %2226 = vst [vmem:[#allocation14 + $0xb8] sm:$0xff] %v2852_v58 }
 0x473   : > { %v2095_v63 = vpop.f32.mrf.mxu0  ;;  %v2159_v53 = vpop.f32.mrf.mxu1 }
 0x474   : > { %2208 = vst [vmem:[#allocation14 + $0x28] sm:$0xff] %v2095_v63  ;;  %2224 = vst [vmem:[#allocation14 + $0xa8] sm:$0xff] %v2159_v53 }
 0x475   : > { %v2839_v42 = vpop.f32.mrf.mxu0  ;;  %v2855_v7 = vpop.f32.mrf.mxu1 }
 0x476   : > { %2213 = vst [vmem:[#allocation14 + $0x50] sm:$0xff] %v2839_v42  ;;  %2229 = vst [vmem:[#allocation14 + $0xd0] sm:$0xff] %v2855_v7 }
 0x477   : > { %v2108_v52 = vpop.f32.mrf.mxu0  ;;  %v2172_v57 = vpop.f32.mrf.mxu1 }
 0x478   : > { %2211 = vst [vmem:[#allocation14 + $0x40] sm:$0xff] %v2108_v52  ;;  %2227 = vst [vmem:[#allocation14 + $0xc0] sm:$0xff] %v2172_v57 }
 0x479   : > { %v2840_v35 = vpop.f32.mrf.mxu0  ;;  %v2856_v17 = vpop.f32.mrf.mxu1 }
 0x47a   : > { %2214 = vst [vmem:[#allocation14 + $0x58] sm:$0xff] %v2840_v35  ;;  %2230 = vst [vmem:[#allocation14 + $0xd8] sm:$0xff] %v2856_v17 }
 0x47b   : > { %v2111_v62 = vpop.f32.mrf.mxu0  ;;  %v2175_v20 = vpop.f32.mrf.mxu1 }
 0x47c   : > { %2212 = vst [vmem:[#allocation14 + $0x48] sm:$0xff] %v2111_v62  ;;  %2228 = vst [vmem:[#allocation14 + $0xc8] sm:$0xff] %v2175_v20 }
 0x47d   : > { %v2843_v43 = vpop.f32.mrf.mxu0  ;;  %v2859_v12 = vpop.f32.mrf.mxu1 }
 0x47e   : > { %2217 = vst [vmem:[#allocation14 + $0x70] sm:$0xff] %v2843_v43  ;;  %2233 = vst [vmem:[#allocation14 + $0xf0] sm:$0xff] %v2859_v12 }
 0x47f   : > { %v2124_v1 = vpop.f32.mrf.mxu0  ;;  %v2188_v60 = vpop.f32.mrf.mxu1 }
 0x480   : > { %2215 = vst [vmem:[#allocation14 + $0x60] sm:$0xff] %v2124_v1  ;;  %2231 = vst [vmem:[#allocation14 + $0xe0] sm:$0xff] %v2188_v60 }
 0x481   : > { %v2844_v5 = vpop.f32.mrf.mxu0  ;;  %v2860_v10 = vpop.f32.mrf.mxu1 }
 0x482   : > { %2218 = vst [vmem:[#allocation14 + $0x78] sm:$0xff] %v2844_v5  ;;  %2234 = vst [vmem:[#allocation14 + $0xf8] sm:$0xff] %v2860_v10 }
 0x483   : > { %v2127_v21 = vpop.f32.mrf.mxu0  ;;  %v2191_v23 = vpop.f32.mrf.mxu1 }
 0x484   : > { %2216 = vst [vmem:[#allocation14 + $0x68] sm:$0xff] %v2127_v21  ;;  %2232 = vst [vmem:[#allocation14 + $0xe8] sm:$0xff] %v2191_v23 }
 0x485 PF: > { %p2922_p11 = scmp.eq.s32.totalorder %s3653_s20, 1  ;;  %s3511_s24 = smov [#allocation14]  }
 0x486   : > { %s2244_s18 = sshll.u32 %s3511_s24, 4  ;;  %s2245_s18 = int_to_ptr.vmem [resolvable:$true] %s2244_s18 }
 0x487   : > { %s3409_s19 = scalar_lea.vmem %s2245_s18, 4096  ;;  %p3416_p13 = scmp.lt.s32.totalorder %s2245_s18, %s2245_s18 }
 0x488   : > { %p3410_p0 = scmp.ne.s32.totalorder %s2245_s18, %s3409_s19  ;;  %p3417_p3 = scmp.lt.s32.totalorder %s3409_s19, %s3409_s19 }
 0x48a   : > { %p3411_p1 = pnand %p3410_p0, %p2922_p11  ;;  %p3418_p2 = por %p3417_p3, %p3416_p13 }
 0x48c   : > { %p3412_p12 = pneg %p3411_p1 }
 0x48e   : > { %p3419_p4 = pnand %p3418_p2, %p3412_p12 }
 0x490   : > { %3422 = shalt.err (!%p3419_p4)
}
 0x491   : > { %s3512_s1 = smov 128   ;;  %s3513_s14 = smov 8  }
 0x492   : > { %2894 = dma.vmem_to_hbm [thread:$0]  (%p2922_p11), %s2245_s18, 4096, %s4290_s6, [#allocation5], %s3512_s1, %s3512_s1, %s3513_s14  }
 0x493   : > { %3474 = dma.done.wait (%p2922_p11), [#allocation5], 4096  }
 0x494   : > { %3476 = vsyncadd (%p2922_p11), [#allocation5], 4294963200 }
 0x495 PF: > { %s25_s26 = sadd.s32 1, %s3499_s26   ;;  %s4312_s21 = smov %s3483_s22 }
 0x496   : > { %p22_p5 = scmp.ge.s32.totalorder %s25_s26, 4   ;;  %s4313_s22 = smov %s3487_s23 }
 0x497   : > { %s4314_s23 = smov %s3596_s9  ;;  %s4315_s24 = smov %s3495_s25 }
 0x498   : > { %s4316_s25 = smov %s4318_s27  ;;  %24 = sbr.rel (!%p22_p5) target bundleno = 14 (0xe), region = 135 }
 0x49d   :  { %2260 = vsyncpa [#allocation4], 1 }
 0x49e   :  { %2262 = vsyncpa [#allocation4 + $0x1], 1 }
 0x49f   :  { %2263 = vsyncpa [#allocation7], 1 }
 0x4a0   :  { %2265 = vsyncpa [#allocation7 + $0x1], 1 }
 0x4a1   :  { %2266 = vsyncpa [#allocation10], 1 }
 0x4a2   :  { %2268 = vsyncpa [#allocation10 + $0x1], 1 }
 0x4a3   :  { %2269 = vsyncpa [#allocation13], 1 }
 0x4a4   :  { %2270 = vsyncpa [#allocation5], 1 }
 0x4a5   :  { %2272 = vsyncpa [#allocation5 + $0x1], 1 }

</bundles_post_ra>
